<compile_context>
chip_gen: v6e
topology: v6e:2x2x1
jax: 0.10.0
libtpu: 0.0.40
codegen_flags: <defaults>
</compile_context>

<pallas_src>
import functools
import math

import jax
import jax.numpy as jnp
from jax import lax
from jax.experimental import pallas as pl
from jax.experimental.pallas import tpu as pltpu


def _round_up(x, m):
    return ((x + m - 1) // m) * m


def _padded_tile_bytes(rows, cols, itemsize):
    """VMEM footprint of a (rows, cols) slab under (8, 128) tiling."""
    return _round_up(max(rows, 1), 8) * _round_up(max(cols, 1), 128) * itemsize


def _choose_tile_h(n_batch, H, W, C, in_item, out_item):
    """Rows of the input image per grid step.

    Big (multi-MiB) tiles to amortize the ~0.35us per-step overhead, but keep
    at least ~8 programs in total (even count -> both v7x TensorCores busy and
    enough pipeline steps), and snap to a divisor of H so every block and its
    one-row bottom halo stay in range (no partial blocks)."""
    per_row = (_padded_tile_bytes(W + 1, C, in_item)            # input rows
               + 2 * _padded_tile_bytes(W, 2 * C, out_item))    # even+odd out
    budget = 6 * 1024 * 1024
    t = max(1, min(H, budget // max(per_row, 1)))
    min_programs = 8
    if n_batch * H >= min_programs:
        t = min(t, max(1, (n_batch * H) // min_programs))
    while H % t != 0:
        t -= 1
    return t


def _make_deconv_kernel(tile_h, W, C):
    """One grid step: tile_h input rows -> 2*tile_h output rows."""

    def kernel(x_ref, xh_ref, w_ref, b_ref, o_ref):
        # x_ref : (1, tile_h, W+1, C)   current rows (with right halo column)
        # xh_ref: (1, 1,      W+1, C)   bottom halo row (row below the tile)
        # w_ref : (6, C, 2C)            per-tap weights, columns = (dw, cout)
        # b_ref : (1, 2C) f32           bias repeated for dw in {0, 1}
        # o_ref : (1, tile_h, 2, W, 2C) output rows, dims (h, dh, w, (dw, c))
        xt = x_ref[0]                                   # (tile_h, W+1, C)
        xb = xh_ref[0]                                  # (1,      W+1, C)
        if tile_h > 1:
            xn = jnp.concatenate([xt[1:], xb], axis=0)  # rows h+1
        else:
            xn = xb

        R = tile_h * W
        x00 = xt[:, :W, :].reshape(R, C)    # x[h,   w  ]
        x01 = xt[:, 1:, :].reshape(R, C)    # x[h,   w+1]
        x10 = xn[:, :W, :].reshape(R, C)    # x[h+1, w  ]
        x11 = xn[:, 1:, :].reshape(R, C)    # x[h+1, w+1]

        bias = b_ref[...]                   # (1, 2C) f32

        def tap(x2d, idx):
            return jnp.dot(x2d, w_ref[idx],
                           preferred_element_type=jnp.float32)

        # Even output rows (dh=0) use kernel row 1 taps of x[h, :].
        y_even = tap(x00, 0) + tap(x01, 1) + bias
        # Odd output rows (dh=1) use kernel row 2 taps of x[h, :] and
        # kernel row 0 taps of x[h+1, :].
        y_odd = tap(x00, 2) + tap(x01, 3) + tap(x10, 4) + tap(x11, 5) + bias

        o_ref[0, :, 0, :, :] = y_even.reshape(tile_h, W, 2 * C).astype(o_ref.dtype)
        o_ref[0, :, 1, :, :] = y_odd.reshape(tile_h, W, 2 * C).astype(o_ref.dtype)

    return kernel


def _conv_transpose2x_pallas(x_nhwc, w, b, *, use_bf16):
    """One ConvTranspose2d(C, C, k=3, s=2, p=1, output_padding=1) layer.

    x_nhwc: (N, H, W, C); w: (Cin=C, Cout=C, 3, 3) (PyTorch layout); b: (C,)
    returns (N, 2H, 2W, C) in the compute dtype (bf16 on the perf path)."""
    N, H, W, C = x_nhwc.shape
    compute_dtype = jnp.bfloat16 if use_bf16 else jnp.float32

    # Halo pad: one zero row below / one zero column right ("no contribution"
    # past the far edge, which is exactly output_padding=1 semantics).
    xp = jnp.pad(x_nhwc.astype(compute_dtype),
                 ((0, 0), (0, 1), (0, 1), (0, 0)))       # (N, H+1, W+1, C)

    # Per-tap (Cin, 2C) matrices; matmul columns ordered (dw, cout).
    wf = w.astype(jnp.float32)
    z = jnp.zeros((C, C), jnp.float32)

    def cols(a, b_):
        return jnp.concatenate([a, b_], axis=1)          # [dw=0 | dw=1]

    w_stack = jnp.stack([
        cols(wf[:, :, 1, 1], wf[:, :, 1, 2]),   # x[h,   w  ] -> even rows
        cols(z,              wf[:, :, 1, 0]),   # x[h,   w+1] -> even rows
        cols(wf[:, :, 2, 1], wf[:, :, 2, 2]),   # x[h,   w  ] -> odd rows
        cols(z,              wf[:, :, 2, 0]),   # x[h,   w+1] -> odd rows
        cols(wf[:, :, 0, 1], wf[:, :, 0, 2]),   # x[h+1, w  ] -> odd rows
        cols(z,              wf[:, :, 0, 0]),   # x[h+1, w+1] -> odd rows
    ], axis=0).astype(compute_dtype)                     # (6, C, 2C)
    b_row = jnp.tile(b.astype(jnp.float32), 2).reshape(1, 2 * C)  # f32 bias

    in_item = jnp.dtype(compute_dtype).itemsize
    tile_h = _choose_tile_h(N, H, W, C, in_item, in_item)
    n_h = H // tile_h

    # Real (layout-padded) VMEM need: 2x double-buffered in/out tiles + halo
    # + weights + bias; cap at 48 MiB so v7x (64 MiB physical) keeps headroom.
    vmem_need = 2 * (tile_h * _padded_tile_bytes(W + 1, C, in_item)
                     + _padded_tile_bytes(W + 1, C, in_item)
                     + 2 * tile_h * _padded_tile_bytes(W, 2 * C, in_item)
                     + 6 * _padded_tile_bytes(C, 2 * C, in_item)
                     + _padded_tile_bytes(1, 2 * C, 4))
    vmem_limit = int(min(48 * 1024 * 1024,
                         max(16 * 1024 * 1024, 2 * vmem_need)))

    flops = 6 * 2 * N * H * W * C * (2 * C)
    bytes_accessed = int(xp.size * in_item
                         + w_stack.size * in_item
                         + b_row.size * 4
                         + N * H * 2 * W * 2 * C * in_item)

    out = pl.pallas_call(
        _make_deconv_kernel(tile_h, W, C),
        out_shape=jax.ShapeDtypeStruct((N, H, 2, W, 2 * C), compute_dtype),
        grid_spec=pltpu.PrefetchScalarGridSpec(
            num_scalar_prefetch=0,
            grid=(N, n_h),
            in_specs=[
                # Current rows of the padded image (full padded width).
                pl.BlockSpec((1, tile_h, W + 1, C),
                             lambda n, i: (n, i, 0, 0)),
                # Bottom halo: the single row just below this tile.
                pl.BlockSpec((1, 1, W + 1, C),
                             lambda n, i: (n, (i + 1) * tile_h, 0, 0)),
                # Resident per-tap weights and bias (same block every step,
                # so they are DMA'd once and reused).
                pl.BlockSpec((6, C, 2 * C), lambda n, i: (0, 0, 0)),
                pl.BlockSpec((1, 2 * C), lambda n, i: (0, 0)),
            ],
            out_specs=pl.BlockSpec((1, tile_h, 2, W, 2 * C),
                                   lambda n, i: (n, i, 0, 0, 0)),
        ),
        compiler_params=pltpu.CompilerParams(
            dimension_semantics=("parallel", "parallel"),
            vmem_limit_bytes=vmem_limit),
        cost_estimate=pl.CostEstimate(flops=flops, transcendentals=0,
                                      bytes_accessed=bytes_accessed),
    )(xp, xp, w_stack, b_row)

    # (N, H, 2, W, 2C) -> (N, 2H, 2W, C): pure row-major reshape, no transpose.
    return out.reshape(N, 2 * H, 2 * W, C)


@functools.partial(jax.jit, static_argnames=("use_bf16",))
def upsample_pallas(x_nchw, weights, biases, *, use_bf16=True):
    """Upsample forward: x (N, C, H, W) -> (N, C, H*2**L, W*2**L)."""
    x = jnp.transpose(x_nchw, (0, 2, 3, 1))       # NHWC internally
    for w, b in zip(weights, biases):
        x = _conv_transpose2x_pallas(x, w, b, use_bf16=use_bf16)
    # Back to NCHW; the cast (bf16 -> f32 on the perf path) fuses with it.
    return jnp.transpose(x, (0, 3, 1, 2)).astype(x_nchw.dtype)


def upsample_ref(x_nchw, weights, biases):
    """Pure-JAX reference (ConvTranspose2d == dilated conv with flipped kernel)."""
    k, s, p, op = 3, 2, 1, 1
    y = x_nchw
    for w, b in zip(weights, biases):
        w_conv = jnp.flip(w, axis=(2, 3)).transpose(1, 0, 2, 3)  # (Cout,Cin,kh,kw)
        y = lax.conv_general_dilated(
            y, w_conv,
            window_strides=(1, 1),
            padding=((k - 1 - p, k - 1 - p + op), (k - 1 - p, k - 1 - p + op)),
            lhs_dilation=(s, s),
            rhs_dilation=(1, 1),
            dimension_numbers=("NCHW", "OIHW", "NCHW"),
            precision=lax.Precision.HIGHEST)
        y = y + b[None, :, None, None]
    return y


def init_upsample_params(key, n_channels, ratio, dtype=jnp.float32):
    """Deterministic init mimicking nn.ConvTranspose2d default (uniform
    +- 1/sqrt(fan_in)); weights in PyTorch layout (Cin, Cout, 3, 3)."""
    n_layers = int(math.log2(ratio))
    lim = 1.0 / math.sqrt(n_channels * 3 * 3)
    weights, biases = [], []
    for _ in range(n_layers):
        key, kw, kb = jax.random.split(key, 3)
        weights.append(jax.random.uniform(
            kw, (n_channels, n_channels, 3, 3), dtype, minval=-lim, maxval=lim))
        biases.append(jax.random.uniform(
            kb, (n_channels,), dtype, minval=-lim, maxval=lim))
    return tuple(weights), tuple(biases)


if __name__ == "__main__":
    # Small shapes consistent with the module.
    N, C, H, W = 2, 4, 16, 16
    ratio = 4   # -> 2 ConvTranspose2d layers, output (2, 4, 64, 64)

    key = jax.random.PRNGKey(0)
    kx, kp = jax.random.split(key)
    x = jax.random.normal(kx, (N, C, H, W), jnp.float32)
    weights, biases = init_upsample_params(kp, C, ratio)

    y_ref = upsample_ref(x, weights, biases)

    # Exact path: f32 activations / weights.
    y_f32 = jax.block_until_ready(
        upsample_pallas(x, weights, biases, use_bf16=False))
    assert y_f32.shape == (N, C, H * ratio, W * ratio), y_f32.shape
    err_f32 = float(jnp.max(jnp.abs(y_f32 - y_ref)))
    assert jnp.allclose(y_f32, y_ref, atol=2e-4, rtol=2e-4), err_f32

    # Default perf path: bf16 activations carried between layers, f32 accum.
    y_bf16 = jax.block_until_ready(upsample_pallas(x, weights, biases))
    assert y_bf16.shape == (N, C, H * ratio, W * ratio), y_bf16.shape
    err_bf16 = float(jnp.max(jnp.abs(y_bf16 - y_ref)))
    assert jnp.allclose(y_bf16, y_ref, atol=1e-1, rtol=1e-1), err_bf16

    print("KERNEL_OK")
</pallas_src>

<mosaic_0001>
module attributes {stable_mosaic.version = 11 : i64} {
  func.func @kernel(%arg0: i32, %arg1: i32, %arg2: memref<1x4x17x4xf32, #tpu.memory_space<vmem>>, %arg3: memref<1x1x17x4xf32, #tpu.memory_space<vmem>>, %arg4: memref<6x4x8xf32, #tpu.memory_space<vmem>>, %arg5: memref<1x8xf32, #tpu.memory_space<vmem>>, %arg6: memref<1x4x2x16x8xf32, #tpu.memory_space<vmem>>) attributes {dimension_semantics = [#tpu.dimension_semantics<parallel>, #tpu.dimension_semantics<parallel>], iteration_bounds = array<i64: 2, 4>, scalar_prefetch = 0 : i64, scratch_operands = 0 : i64, tpu.core_type = #tpu.core_type<tc>, window_params = [{transform_indices = @transform_0, window_bounds = array<i64: 1, 4, 17, 4>}, {transform_indices = @transform_1, window_bounds = array<i64: 1, 1, 17, 4>}, {pipeline_mode = #tpu.pipeline_mode<synchronous>, transform_indices = @transform_2, window_bounds = array<i64: 6, 4, 8>}, {pipeline_mode = #tpu.pipeline_mode<synchronous>, transform_indices = @transform_3, window_bounds = array<i64: 1, 8>}, {transform_indices = @transform_4, window_bounds = array<i64: 1, 4, 2, 16, 8>}]} {
    %c0 = arith.constant 0 : index
    %c0_0 = arith.constant 0 : index
    %c0_1 = arith.constant 0 : index
    %c0_2 = arith.constant 0 : index
    %0 = vector.load %arg2[%c0, %c0_0, %c0_1, %c0_2] : memref<1x4x17x4xf32, #tpu.memory_space<vmem>>, vector<1x4x17x4xf32>
    %1 = vector.shape_cast %0 : vector<1x4x17x4xf32> to vector<4x17x4xf32>
    %c0_3 = arith.constant 0 : index
    %c0_4 = arith.constant 0 : index
    %c0_5 = arith.constant 0 : index
    %c0_6 = arith.constant 0 : index
    %2 = vector.load %arg3[%c0_3, %c0_4, %c0_5, %c0_6] : memref<1x1x17x4xf32, #tpu.memory_space<vmem>>, vector<1x1x17x4xf32>
    %3 = vector.shape_cast %2 : vector<1x1x17x4xf32> to vector<1x17x4xf32>
    %4 = vector.extract_strided_slice %1 {offsets = [1, 0, 0], sizes = [3, 17, 4], strides = [1, 1, 1]} : vector<4x17x4xf32> to vector<3x17x4xf32>
    %5 = tpu.concatenate %4, %3 in 0 : vector<3x17x4xf32>, vector<1x17x4xf32> -> vector<4x17x4xf32>
    %6 = vector.extract_strided_slice %1 {offsets = [0, 0, 0], sizes = [4, 16, 4], strides = [1, 1, 1]} : vector<4x17x4xf32> to vector<4x16x4xf32>
    %7 = vector.shape_cast %6 : vector<4x16x4xf32> to vector<64x4xf32>
    %8 = vector.extract_strided_slice %1 {offsets = [0, 1, 0], sizes = [4, 16, 4], strides = [1, 1, 1]} : vector<4x17x4xf32> to vector<4x16x4xf32>
    %9 = vector.shape_cast %8 : vector<4x16x4xf32> to vector<64x4xf32>
    %10 = vector.extract_strided_slice %5 {offsets = [0, 0, 0], sizes = [4, 16, 4], strides = [1, 1, 1]} : vector<4x17x4xf32> to vector<4x16x4xf32>
    %11 = vector.shape_cast %10 : vector<4x16x4xf32> to vector<64x4xf32>
    %12 = vector.extract_strided_slice %5 {offsets = [0, 1, 0], sizes = [4, 16, 4], strides = [1, 1, 1]} : vector<4x17x4xf32> to vector<4x16x4xf32>
    %13 = vector.shape_cast %12 : vector<4x16x4xf32> to vector<64x4xf32>
    %c0_7 = arith.constant 0 : index
    %c0_8 = arith.constant 0 : index
    %14 = vector.load %arg5[%c0_7, %c0_8] : memref<1x8xf32, #tpu.memory_space<vmem>>, vector<1x8xf32>
    %c0_9 = arith.constant 0 : index
    %c0_10 = arith.constant 0 : index
    %c0_11 = arith.constant 0 : index
    %15 = vector.load %arg4[%c0_9, %c0_10, %c0_11] : memref<6x4x8xf32, #tpu.memory_space<vmem>>, vector<1x4x8xf32>
    %16 = vector.shape_cast %15 : vector<1x4x8xf32> to vector<4x8xf32>
    %cst = arith.constant dense<0.000000e+00> : vector<64x8xf32>
    %17 = tpu.matmul %7, %16, %cst {dimension_numbers = #tpu.dot_dimension_numbers<[1], [0], [0], [1], [0, 0, 1, 1], [], []>} : vector<64x4xf32>, vector<4x8xf32>, vector<64x8xf32> -> vector<64x8xf32>
    %c1 = arith.constant 1 : index
    %c0_12 = arith.constant 0 : index
    %c0_13 = arith.constant 0 : index
    %18 = vector.load %arg4[%c1, %c0_12, %c0_13] : memref<6x4x8xf32, #tpu.memory_space<vmem>>, vector<1x4x8xf32>
    %19 = vector.shape_cast %18 : vector<1x4x8xf32> to vector<4x8xf32>
    %cst_14 = arith.constant dense<0.000000e+00> : vector<64x8xf32>
    %20 = tpu.matmul %9, %19, %cst_14 {dimension_numbers = #tpu.dot_dimension_numbers<[1], [0], [0], [1], [0, 0, 1, 1], [], []>} : vector<64x4xf32>, vector<4x8xf32>, vector<64x8xf32> -> vector<64x8xf32>
    %21 = arith.addf %17, %20 : vector<64x8xf32>
    %22 = vector.broadcast %14 : vector<1x8xf32> to vector<64x8xf32>
    %23 = arith.addf %21, %22 : vector<64x8xf32>
    %c2 = arith.constant 2 : index
    %c0_15 = arith.constant 0 : index
    %c0_16 = arith.constant 0 : index
    %24 = vector.load %arg4[%c2, %c0_15, %c0_16] : memref<6x4x8xf32, #tpu.memory_space<vmem>>, vector<1x4x8xf32>
    %25 = vector.shape_cast %24 : vector<1x4x8xf32> to vector<4x8xf32>
    %cst_17 = arith.constant dense<0.000000e+00> : vector<64x8xf32>
    %26 = tpu.matmul %7, %25, %cst_17 {dimension_numbers = #tpu.dot_dimension_numbers<[1], [0], [0], [1], [0, 0, 1, 1], [], []>} : vector<64x4xf32>, vector<4x8xf32>, vector<64x8xf32> -> vector<64x8xf32>
    %c3 = arith.constant 3 : index
    %c0_18 = arith.constant 0 : index
    %c0_19 = arith.constant 0 : index
    %27 = vector.load %arg4[%c3, %c0_18, %c0_19] : memref<6x4x8xf32, #tpu.memory_space<vmem>>, vector<1x4x8xf32>
    %28 = vector.shape_cast %27 : vector<1x4x8xf32> to vector<4x8xf32>
    %cst_20 = arith.constant dense<0.000000e+00> : vector<64x8xf32>
    %29 = tpu.matmul %9, %28, %cst_20 {dimension_numbers = #tpu.dot_dimension_numbers<[1], [0], [0], [1], [0, 0, 1, 1], [], []>} : vector<64x4xf32>, vector<4x8xf32>, vector<64x8xf32> -> vector<64x8xf32>
    %30 = arith.addf %26, %29 : vector<64x8xf32>
    %c4 = arith.constant 4 : index
    %c0_21 = arith.constant 0 : index
    %c0_22 = arith.constant 0 : index
    %31 = vector.load %arg4[%c4, %c0_21, %c0_22] : memref<6x4x8xf32, #tpu.memory_space<vmem>>, vector<1x4x8xf32>
    %32 = vector.shape_cast %31 : vector<1x4x8xf32> to vector<4x8xf32>
    %cst_23 = arith.constant dense<0.000000e+00> : vector<64x8xf32>
    %33 = tpu.matmul %11, %32, %cst_23 {dimension_numbers = #tpu.dot_dimension_numbers<[1], [0], [0], [1], [0, 0, 1, 1], [], []>} : vector<64x4xf32>, vector<4x8xf32>, vector<64x8xf32> -> vector<64x8xf32>
    %34 = arith.addf %30, %33 : vector<64x8xf32>
    %c5 = arith.constant 5 : index
    %c0_24 = arith.constant 0 : index
    %c0_25 = arith.constant 0 : index
    %35 = vector.load %arg4[%c5, %c0_24, %c0_25] : memref<6x4x8xf32, #tpu.memory_space<vmem>>, vector<1x4x8xf32>
    %36 = vector.shape_cast %35 : vector<1x4x8xf32> to vector<4x8xf32>
    %cst_26 = arith.constant dense<0.000000e+00> : vector<64x8xf32>
    %37 = tpu.matmul %13, %36, %cst_26 {dimension_numbers = #tpu.dot_dimension_numbers<[1], [0], [0], [1], [0, 0, 1, 1], [], []>} : vector<64x4xf32>, vector<4x8xf32>, vector<64x8xf32> -> vector<64x8xf32>
    %38 = arith.addf %34, %37 : vector<64x8xf32>
    %39 = vector.broadcast %14 : vector<1x8xf32> to vector<64x8xf32>
    %40 = arith.addf %38, %39 : vector<64x8xf32>
    %41 = vector.shape_cast %23 : vector<64x8xf32> to vector<4x16x8xf32>
    %c0_27 = arith.constant 0 : index
    %c0_28 = arith.constant 0 : index
    %c0_29 = arith.constant 0 : index
    %c0_30 = arith.constant 0 : index
    %c0_31 = arith.constant 0 : index
    %42 = vector.load %arg6[%c0_27, %c0_28, %c0_29, %c0_30, %c0_31] : memref<1x4x2x16x8xf32, #tpu.memory_space<vmem>>, vector<1x4x1x16x8xf32>
    %43 = vector.shape_cast %42 : vector<1x4x1x16x8xf32> to vector<4x16x8xf32>
    %44 = vector.shape_cast %41 : vector<4x16x8xf32> to vector<1x4x1x16x8xf32>
    tpu.vector_store %arg6[%c0_27, %c0_28, %c0_29, %c0_30, %c0_31], %44 {strides = array<i32>} : memref<1x4x2x16x8xf32, #tpu.memory_space<vmem>>, vector<1x4x1x16x8xf32>,
    %45 = vector.shape_cast %40 : vector<64x8xf32> to vector<4x16x8xf32>
    %c0_32 = arith.constant 0 : index
    %c0_33 = arith.constant 0 : index
    %c1_34 = arith.constant 1 : index
    %c0_35 = arith.constant 0 : index
    %c0_36 = arith.constant 0 : index
    %46 = vector.load %arg6[%c0_32, %c0_33, %c1_34, %c0_35, %c0_36] : memref<1x4x2x16x8xf32, #tpu.memory_space<vmem>>, vector<1x4x1x16x8xf32>
    %47 = vector.shape_cast %46 : vector<1x4x1x16x8xf32> to vector<4x16x8xf32>
    %48 = vector.shape_cast %45 : vector<4x16x8xf32> to vector<1x4x1x16x8xf32>
    tpu.vector_store %arg6[%c0_32, %c0_33, %c1_34, %c0_35, %c0_36], %48 {strides = array<i32>} : memref<1x4x2x16x8xf32, #tpu.memory_space<vmem>>, vector<1x4x1x16x8xf32>,
    return
  }
  func.func @transform_0(%arg0: i32, %arg1: i32) -> (i32, i32, i32, i32) {
    %c0_i32 = arith.constant 0 : i32
    %c0_i32_0 = arith.constant 0 : i32
    %c0_i32_1 = arith.constant 0 : i32
    return %arg0, %arg1, %c0_i32, %c0_i32_0 : i32, i32, i32, i32
  }
  func.func @transform_1(%arg0: i32, %arg1: i32) -> (i32, i32, i32, i32) {
    %c1_i32 = arith.constant 1 : i32
    %0 = arith.addi %arg1, %c1_i32 : i32
    %c4_i32 = arith.constant 4 : i32
    %1 = arith.muli %0, %c4_i32 : i32
    %c0_i32 = arith.constant 0 : i32
    %c0_i32_0 = arith.constant 0 : i32
    %c0_i32_1 = arith.constant 0 : i32
    return %arg0, %1, %c0_i32, %c0_i32_0 : i32, i32, i32, i32
  }
  func.func @transform_2(%arg0: i32, %arg1: i32) -> (i32, i32, i32) {
    %c0_i32 = arith.constant 0 : i32
    %c0_i32_0 = arith.constant 0 : i32
    %c0_i32_1 = arith.constant 0 : i32
    %c0_i32_2 = arith.constant 0 : i32
    return %c0_i32, %c0_i32_0, %c0_i32_1 : i32, i32, i32
  }
  func.func @transform_3(%arg0: i32, %arg1: i32) -> (i32, i32) {
    %c0_i32 = arith.constant 0 : i32
    %c0_i32_0 = arith.constant 0 : i32
    %c0_i32_1 = arith.constant 0 : i32
    return %c0_i32, %c0_i32_0 : i32, i32
  }
  func.func @transform_4(%arg0: i32, %arg1: i32) -> (i32, i32, i32, i32, i32) {
    %c0_i32 = arith.constant 0 : i32
    %c0_i32_0 = arith.constant 0 : i32
    %c0_i32_1 = arith.constant 0 : i32
    %c0_i32_2 = arith.constant 0 : i32
    return %arg0, %arg1, %c0_i32, %c0_i32_0, %c0_i32_1 : i32, i32, i32, i32, i32
  }
}

module attributes {stable_mosaic.version = 11 : i64} {
  func.func @kernel(%arg0: i32, %arg1: i32, %arg2: memref<1x8x33x4xf32, #tpu.memory_space<vmem>>, %arg3: memref<1x1x33x4xf32, #tpu.memory_space<vmem>>, %arg4: memref<6x4x8xf32, #tpu.memory_space<vmem>>, %arg5: memref<1x8xf32, #tpu.memory_space<vmem>>, %arg6: memref<1x8x2x32x8xf32, #tpu.memory_space<vmem>>) attributes {dimension_semantics = [#tpu.dimension_semantics<parallel>, #tpu.dimension_semantics<parallel>], iteration_bounds = array<i64: 2, 4>, scalar_prefetch = 0 : i64, scratch_operands = 0 : i64, tpu.core_type = #tpu.core_type<tc>, window_params = [{transform_indices = @transform_0, window_bounds = array<i64: 1, 8, 33, 4>}, {transform_indices = @transform_1, window_bounds = array<i64: 1, 1, 33, 4>}, {pipeline_mode = #tpu.pipeline_mode<synchronous>, transform_indices = @transform_2, window_bounds = array<i64: 6, 4, 8>}, {pipeline_mode = #tpu.pipeline_mode<synchronous>, transform_indices = @transform_3, window_bounds = array<i64: 1, 8>}, {transform_indices = @transform_4, window_bounds = array<i64: 1, 8, 2, 32, 8>}]} {
    %c0 = arith.constant 0 : index
    %c0_0 = arith.constant 0 : index
    %c0_1 = arith.constant 0 : index
    %c0_2 = arith.constant 0 : index
    %0 = vector.load %arg2[%c0, %c0_0, %c0_1, %c0_2] : memref<1x8x33x4xf32, #tpu.memory_space<vmem>>, vector<1x8x33x4xf32>
    %1 = vector.shape_cast %0 : vector<1x8x33x4xf32> to vector<8x33x4xf32>
    %c0_3 = arith.constant 0 : index
    %c0_4 = arith.constant 0 : index
    %c0_5 = arith.constant 0 : index
    %c0_6 = arith.constant 0 : index
    %2 = vector.load %arg3[%c0_3, %c0_4, %c0_5, %c0_6] : memref<1x1x33x4xf32, #tpu.memory_space<vmem>>, vector<1x1x33x4xf32>
    %3 = vector.shape_cast %2 : vector<1x1x33x4xf32> to vector<1x33x4xf32>
    %4 = vector.extract_strided_slice %1 {offsets = [1, 0, 0], sizes = [7, 33, 4], strides = [1, 1, 1]} : vector<8x33x4xf32> to vector<7x33x4xf32>
    %5 = tpu.concatenate %4, %3 in 0 : vector<7x33x4xf32>, vector<1x33x4xf32> -> vector<8x33x4xf32>
    %6 = vector.extract_strided_slice %1 {offsets = [0, 0, 0], sizes = [8, 32, 4], strides = [1, 1, 1]} : vector<8x33x4xf32> to vector<8x32x4xf32>
    %7 = vector.shape_cast %6 : vector<8x32x4xf32> to vector<256x4xf32>
    %8 = vector.extract_strided_slice %1 {offsets = [0, 1, 0], sizes = [8, 32, 4], strides = [1, 1, 1]} : vector<8x33x4xf32> to vector<8x32x4xf32>
    %9 = vector.shape_cast %8 : vector<8x32x4xf32> to vector<256x4xf32>
    %10 = vector.extract_strided_slice %5 {offsets = [0, 0, 0], sizes = [8, 32, 4], strides = [1, 1, 1]} : vector<8x33x4xf32> to vector<8x32x4xf32>
    %11 = vector.shape_cast %10 : vector<8x32x4xf32> to vector<256x4xf32>
    %12 = vector.extract_strided_slice %5 {offsets = [0, 1, 0], sizes = [8, 32, 4], strides = [1, 1, 1]} : vector<8x33x4xf32> to vector<8x32x4xf32>
    %13 = vector.shape_cast %12 : vector<8x32x4xf32> to vector<256x4xf32>
    %c0_7 = arith.constant 0 : index
    %c0_8 = arith.constant 0 : index
    %14 = vector.load %arg5[%c0_7, %c0_8] : memref<1x8xf32, #tpu.memory_space<vmem>>, vector<1x8xf32>
    %c0_9 = arith.constant 0 : index
    %c0_10 = arith.constant 0 : index
    %c0_11 = arith.constant 0 : index
    %15 = vector.load %arg4[%c0_9, %c0_10, %c0_11] : memref<6x4x8xf32, #tpu.memory_space<vmem>>, vector<1x4x8xf32>
    %16 = vector.shape_cast %15 : vector<1x4x8xf32> to vector<4x8xf32>
    %cst = arith.constant dense<0.000000e+00> : vector<256x8xf32>
    %17 = tpu.matmul %7, %16, %cst {dimension_numbers = #tpu.dot_dimension_numbers<[1], [0], [0], [1], [0, 0, 1, 1], [], []>} : vector<256x4xf32>, vector<4x8xf32>, vector<256x8xf32> -> vector<256x8xf32>
    %c1 = arith.constant 1 : index
    %c0_12 = arith.constant 0 : index
    %c0_13 = arith.constant 0 : index
    %18 = vector.load %arg4[%c1, %c0_12, %c0_13] : memref<6x4x8xf32, #tpu.memory_space<vmem>>, vector<1x4x8xf32>
    %19 = vector.shape_cast %18 : vector<1x4x8xf32> to vector<4x8xf32>
    %cst_14 = arith.constant dense<0.000000e+00> : vector<256x8xf32>
    %20 = tpu.matmul %9, %19, %cst_14 {dimension_numbers = #tpu.dot_dimension_numbers<[1], [0], [0], [1], [0, 0, 1, 1], [], []>} : vector<256x4xf32>, vector<4x8xf32>, vector<256x8xf32> -> vector<256x8xf32>
    %21 = arith.addf %17, %20 : vector<256x8xf32>
    %22 = vector.broadcast %14 : vector<1x8xf32> to vector<256x8xf32>
    %23 = arith.addf %21, %22 : vector<256x8xf32>
    %c2 = arith.constant 2 : index
    %c0_15 = arith.constant 0 : index
    %c0_16 = arith.constant 0 : index
    %24 = vector.load %arg4[%c2, %c0_15, %c0_16] : memref<6x4x8xf32, #tpu.memory_space<vmem>>, vector<1x4x8xf32>
    %25 = vector.shape_cast %24 : vector<1x4x8xf32> to vector<4x8xf32>
    %cst_17 = arith.constant dense<0.000000e+00> : vector<256x8xf32>
    %26 = tpu.matmul %7, %25, %cst_17 {dimension_numbers = #tpu.dot_dimension_numbers<[1], [0], [0], [1], [0, 0, 1, 1], [], []>} : vector<256x4xf32>, vector<4x8xf32>, vector<256x8xf32> -> vector<256x8xf32>
    %c3 = arith.constant 3 : index
    %c0_18 = arith.constant 0 : index
    %c0_19 = arith.constant 0 : index
    %27 = vector.load %arg4[%c3, %c0_18, %c0_19] : memref<6x4x8xf32, #tpu.memory_space<vmem>>, vector<1x4x8xf32>
    %28 = vector.shape_cast %27 : vector<1x4x8xf32> to vector<4x8xf32>
    %cst_20 = arith.constant dense<0.000000e+00> : vector<256x8xf32>
    %29 = tpu.matmul %9, %28, %cst_20 {dimension_numbers = #tpu.dot_dimension_numbers<[1], [0], [0], [1], [0, 0, 1, 1], [], []>} : vector<256x4xf32>, vector<4x8xf32>, vector<256x8xf32> -> vector<256x8xf32>
    %30 = arith.addf %26, %29 : vector<256x8xf32>
    %c4 = arith.constant 4 : index
    %c0_21 = arith.constant 0 : index
    %c0_22 = arith.constant 0 : index
    %31 = vector.load %arg4[%c4, %c0_21, %c0_22] : memref<6x4x8xf32, #tpu.memory_space<vmem>>, vector<1x4x8xf32>
    %32 = vector.shape_cast %31 : vector<1x4x8xf32> to vector<4x8xf32>
    %cst_23 = arith.constant dense<0.000000e+00> : vector<256x8xf32>
    %33 = tpu.matmul %11, %32, %cst_23 {dimension_numbers = #tpu.dot_dimension_numbers<[1], [0], [0], [1], [0, 0, 1, 1], [], []>} : vector<256x4xf32>, vector<4x8xf32>, vector<256x8xf32> -> vector<256x8xf32>
    %34 = arith.addf %30, %33 : vector<256x8xf32>
    %c5 = arith.constant 5 : index
    %c0_24 = arith.constant 0 : index
    %c0_25 = arith.constant 0 : index
    %35 = vector.load %arg4[%c5, %c0_24, %c0_25] : memref<6x4x8xf32, #tpu.memory_space<vmem>>, vector<1x4x8xf32>
    %36 = vector.shape_cast %35 : vector<1x4x8xf32> to vector<4x8xf32>
    %cst_26 = arith.constant dense<0.000000e+00> : vector<256x8xf32>
    %37 = tpu.matmul %13, %36, %cst_26 {dimension_numbers = #tpu.dot_dimension_numbers<[1], [0], [0], [1], [0, 0, 1, 1], [], []>} : vector<256x4xf32>, vector<4x8xf32>, vector<256x8xf32> -> vector<256x8xf32>
    %38 = arith.addf %34, %37 : vector<256x8xf32>
    %39 = vector.broadcast %14 : vector<1x8xf32> to vector<256x8xf32>
    %40 = arith.addf %38, %39 : vector<256x8xf32>
    %41 = vector.shape_cast %23 : vector<256x8xf32> to vector<8x32x8xf32>
    %c0_27 = arith.constant 0 : index
    %c0_28 = arith.constant 0 : index
    %c0_29 = arith.constant 0 : index
    %c0_30 = arith.constant 0 : index
    %c0_31 = arith.constant 0 : index
    %42 = vector.load %arg6[%c0_27, %c0_28, %c0_29, %c0_30, %c0_31] : memref<1x8x2x32x8xf32, #tpu.memory_space<vmem>>, vector<1x8x1x32x8xf32>
    %43 = vector.shape_cast %42 : vector<1x8x1x32x8xf32> to vector<8x32x8xf32>
    %44 = vector.shape_cast %41 : vector<8x32x8xf32> to vector<1x8x1x32x8xf32>
    tpu.vector_store %arg6[%c0_27, %c0_28, %c0_29, %c0_30, %c0_31], %44 {strides = array<i32>} : memref<1x8x2x32x8xf32, #tpu.memory_space<vmem>>, vector<1x8x1x32x8xf32>,
    %45 = vector.shape_cast %40 : vector<256x8xf32> to vector<8x32x8xf32>
    %c0_32 = arith.constant 0 : index
    %c0_33 = arith.constant 0 : index
    %c1_34 = arith.constant 1 : index
    %c0_35 = arith.constant 0 : index
    %c0_36 = arith.constant 0 : index
    %46 = vector.load %arg6[%c0_32, %c0_33, %c1_34, %c0_35, %c0_36] : memref<1x8x2x32x8xf32, #tpu.memory_space<vmem>>, vector<1x8x1x32x8xf32>
    %47 = vector.shape_cast %46 : vector<1x8x1x32x8xf32> to vector<8x32x8xf32>
    %48 = vector.shape_cast %45 : vector<8x32x8xf32> to vector<1x8x1x32x8xf32>
    tpu.vector_store %arg6[%c0_32, %c0_33, %c1_34, %c0_35, %c0_36], %48 {strides = array<i32>} : memref<1x8x2x32x8xf32, #tpu.memory_space<vmem>>, vector<1x8x1x32x8xf32>,
    return
  }
  func.func @transform_0(%arg0: i32, %arg1: i32) -> (i32, i32, i32, i32) {
    %c0_i32 = arith.constant 0 : i32
    %c0_i32_0 = arith.constant 0 : i32
    %c0_i32_1 = arith.constant 0 : i32
    return %arg0, %arg1, %c0_i32, %c0_i32_0 : i32, i32, i32, i32
  }
  func.func @transform_1(%arg0: i32, %arg1: i32) -> (i32, i32, i32, i32) {
    %c1_i32 = arith.constant 1 : i32
    %0 = arith.addi %arg1, %c1_i32 : i32
    %c8_i32 = arith.constant 8 : i32
    %1 = arith.muli %0, %c8_i32 : i32
    %c0_i32 = arith.constant 0 : i32
    %c0_i32_0 = arith.constant 0 : i32
    %c0_i32_1 = arith.constant 0 : i32
    return %arg0, %1, %c0_i32, %c0_i32_0 : i32, i32, i32, i32
  }
  func.func @transform_2(%arg0: i32, %arg1: i32) -> (i32, i32, i32) {
    %c0_i32 = arith.constant 0 : i32
    %c0_i32_0 = arith.constant 0 : i32
    %c0_i32_1 = arith.constant 0 : i32
    %c0_i32_2 = arith.constant 0 : i32
    return %c0_i32, %c0_i32_0, %c0_i32_1 : i32, i32, i32
  }
  func.func @transform_3(%arg0: i32, %arg1: i32) -> (i32, i32) {
    %c0_i32 = arith.constant 0 : i32
    %c0_i32_0 = arith.constant 0 : i32
    %c0_i32_1 = arith.constant 0 : i32
    return %c0_i32, %c0_i32_0 : i32, i32
  }
  func.func @transform_4(%arg0: i32, %arg1: i32) -> (i32, i32, i32, i32, i32) {
    %c0_i32 = arith.constant 0 : i32
    %c0_i32_0 = arith.constant 0 : i32
    %c0_i32_1 = arith.constant 0 : i32
    %c0_i32_2 = arith.constant 0 : i32
    return %arg0, %arg1, %c0_i32, %c0_i32_0, %c0_i32_1 : i32, i32, i32, i32, i32
  }
}

</mosaic_0001>

<bundles_post_ra>
// kernel: tile.14
= control target key start
LH: loop header
LB: loop body
LE: loop exit
PB: predicated region body
PF: predicated region fallthrough
CT: control target
= control target key end

     0   :  { %vm8_vm0 = vcmask 31744   ;;  %vm14_vm1 = vcmask 64544   ;;  %s42_s0 = inlined_call_operand.vmem [shape: f32[2,4], index: 0, kind: input, shape index: {}]   ;;  %s43_s1 = inlined_call_operand.vmem [shape: f32[1,8], index: 1, kind: output, shape index: {}]  }
   0x1   :  { %v5_v0 = vld [vmem:[%s42_s0] sm:$0x3]  ;;  %s25_s0 = smov 4  }
   0x2   :  { %6 = vst [vmem:[#allocation1] sm:$0x3] %v5_v0 }
   0x9   :  { %v11_v1 = vld [vmem:[#allocation1 + $0x1] sm:$0x1]   ;;  %v7_v2 = vld [vmem:[#allocation1] sm:$0x1]  }
   0xa   :  { %12 = vrot.lane.b32.xlu0 %v11_v1, %s25_s0  ;;  %9 = vst.msk [vmem:[#allocation0] sm:$0x1] %vm8_vm0, %v7_v2  }
  0x7c   :  { %v13_v3 = vpop.permute.xlu0 %12  }
  0x7d   :  { %15 = vst.msk [vmem:[#allocation0] sm:$0x1] %vm14_vm1, %v13_v3  }
  0x84   :  { %v20_v4 = vld [vmem:[#allocation0] sm:$0x1] }
  0x85   :  { %23 = vst [vmem:[%s43_s1] sm:$0x1] %v20_v4 }

// kernel: tile.13
= control target key start
LH: loop header
LB: loop body
LE: loop exit
PB: predicated region body
PF: predicated region fallthrough
CT: control target
= control target key end

     0   :  { %2 = vsyncpa [#allocation1], 0  ;;  %s42_s6 = smov [#allocation0]   ;;  %s59_s0 = inlined_call_operand.hbm [shape: f32[4], index: 0, kind: input, shape index: {}]   ;;  %s60_s1 = inlined_call_operand.vmem [shape: f32[2,4], index: 1, kind: output, shape index: {}]  }
   0x1   :  { %s9_s7 = sshll.u32 %s42_s6, 4  ;;  %s10_s7 = int_to_ptr.vmem [resolvable:$true] %s9_s7 }
   0x2   :  { %s28_s8 = scalar_lea.vmem %s10_s7, 16  ;;  %s32_s9 = scalar_lea.vmem %s10_s7, 32 }
   0x3   :  { %p29_p0 = scmp.ne.s32.totalorder %s10_s7, %s28_s8  ;;  %p33_p1 = scmp.lt.s32.totalorder %s10_s7, %s10_s7 }
   0x4   :  { %p34_p2 = scmp.lt.s32.totalorder %s32_s9, %s28_s8 }
   0x6   :  { %p35_p3 = por %p34_p2, %p33_p1 }
   0x8   :  { %p36_p4 = pnand %p35_p3, %p29_p0 }
   0xa   :  { %39 = shalt.err (!%p36_p4)
}
   0xb   :  { %12 = dma.hbm_to_vmem [thread:$0]  %s59_s0, 16, %s10_s7, [#allocation1]  }
   0xc   :  { %40 = dma.done.wait [#allocation1], 16  }
   0xd   :  { %41 = vsyncadd [#allocation1], 4294967280  ;;  %v16_v0 = vld [vmem:[#allocation0] ss:$0 sm:$0xff] }
   0xe   :  { %17 = vst [vmem:[%s60_s1] sm:$0x3] %v16_v0 }
   0xf   :  { %18 = vsyncpa [#allocation1], 1 }

// kernel: upsample_pallas.2
= control target key start
LH: loop header
LB: loop body
LE: loop exit
PB: predicated region body
PF: predicated region fallthrough
CT: control target
= control target key end

     0   :  { %s1586_s15 = smov 0   ;;  %s1588_s16 = smov 0   ;;  %s1851_s0 = inlined_call_operand.vmem [shape: f32[2,17,17,4], index: 0, kind: input, shape index: {}, may-alias: {0,1}]   ;;  %s1852_s1 = inlined_call_operand.vmem [shape: f32[2,17,17,4], index: 1, kind: input, shape index: {}, may-alias: {0,1}]   ;;  %s1853_s2 = inlined_call_operand.vmem [shape: f32[6,4,8], index: 2, kind: input, shape index: {}]   ;;  %s1854_s3 = inlined_call_operand.vmem [shape: f32[1,8], index: 3, kind: input, shape index: {}]   ;;  %s1855_s4 = inlined_call_operand.vmem [shape: f32[2,16,2,16,8], index: 4, kind: output, shape index: {}]  }
   0x1   :  { %s1590_s17 = smov 0   ;;  %s1592_s18 = smov 0  }
   0x2   :  { %s1594_s19 = smov 0  }
   0x3 LB: > { %s23_s20 = sadd.s32 1, %s1551_s17  ;;  %s26_s21 = sadd.s32 1, %s1555_s18  ;;  %s1559_s19 = sphi %s1594_s19, %s14_s19   ;;  %s1555_s18 = sphi %s1592_s18, %s1859_s18   ;;  %s1551_s17 = sphi %s1590_s17, %s1858_s17   ;;  %s1547_s16 = sphi %s1588_s16, %s1857_s16   ;;  %s1543_s15 = sphi %s1586_s15, %s1856_s15  }
   0x4   : > { %p24_p0 = scmp.ge.s32.totalorder %s23_s20, 4  ;;  %p1255_p1 = scmp.ge.s32.totalorder %s1559_s19, 1 }
   0x5   : > { %p218_p2 = scmp.lt.s32.totalorder %s1559_s19, 9 }
   0x6   : > { %s1861_s20 = smov (%p24_p0, %s23_s20), 0  ;;  %s1863_s21 = smov (!%p24_p0, %s26_s21), %s1555_s18 }
   0x7   : > { %p219_p3 = pnand %p1255_p1, %p218_p2  ;;  %p28_p4 = scmp.ge.s32.totalorder %s1863_s21, 2 }
   0x8   : > { %s1622_s26 = sshll.u32 (!%p219_p3), %s1543_s15, 2  ;;  %p276_p5 = scmp.lt.s32.totalorder (!%p219_p3), %s1547_s16, 1 }
   0x9   : > { %s1865_s21 = smov (%p28_p4, %s1863_s21), 0  ;;  %222 = sbr.rel (%p219_p3) target bundleno = 273 (0x111), region = 36 }
   0xa   : > { %p278_p6 = scmp.lt.s32.totalorder (!%p219_p3), %s1622_s26, 16  ;;  %p307_p7 = scmp.lt.s32.totalorder (!%p219_p3), %s1622_s26, 15 }
   0xb   : > { %s1339_s28 = sadd.s32 (!%p219_p3), 4, %s1622_s26 }
   0xc   : > { %p295_p8 = scmp.lt.s32.totalorder (!%p219_p3), %s1339_s28, 16 }
   0xe   : > { %v1264_v0 = vld [vmem:[%s1853_s2 + $0x4] sm:$0xf]  ;;  %vm392_vm0 = vcmask 1043456   ;;  %v372_v1 = vld [vmem:[%s1853_s2] sm:$0xf]  ;;  %s1867_s16 = smov (!%p276_p5, %s1547_s16), 1 }
   0xf   : > { %1394 = vmatprep.subr.msk.mxu0 %vm392_vm0, %v1264_v0  ;;  %1408 = vmatprep.subr.msk.mxu1 %vm392_vm0, %v372_v1  ;;  %v1285_v2 = vld [vmem:[%s1853_s2 + $0xc] sm:$0xf]  ;;  %v1284_v3 = vld [vmem:[%s1853_s2 + $0x8] sm:$0xf]  ;;  %s279_s5 = scalar_select %p278_p6, %s1622_s26, 16  ;;  %vm375_vm1 = vcmask 31744  }
  0x10   : > { %1395 = vmatpush3.msk.msra.mxu0 %vm392_vm0, %v1264_v0  ;;  %1409 = vmatpush3.msk.msra.mxu1 %vm392_vm0, %v372_v1  ;;  %s1479_s6 = smul.u32 51, %s1867_s16  ;;  %s1262_s8 = sshll.u32 %s1867_s16, 6  ;;  %v1314_v4 = vld [vmem:[%s1853_s2 + $0x14] sm:$0xf]  ;;  %vm342_vm2 = vcmask 1046528   ;;  %vm1111_vm3 = vcmask 64512  }
  0x11   : > { %1422 = vmatprep.subr.msk.mxu0 %vm392_vm0, %v1285_v2  ;;  %1436 = vmatprep.subr.msk.mxu1 %vm392_vm0, %v1284_v3  ;;  %s1478_s7 = smul.u32 3, %s279_s5  ;;  %v1304_v27 = vld [vmem:[%s1853_s2 + $0x10] sm:$0xf]  ;;  %s1869_s28 = smov (!%p295_p8, %s1339_s28), 16  ;;  %v1781_v49 = vld [vmem:[%s1854_s3] ss:$0 sm:$0xff] }
  0x12   : > { %s308_s9 = scalar_select %p307_p7, %s1622_s26, 15 }
  0x13   : > { %s282_s10 = sadd.s32 %s1479_s6, %s1478_s7  ;;  %s1480_s26 = smul.u32 3, %s1869_s28 }
  0x14   : > { %s1257_s11 = sshll.u32 %s282_s10, 3  ;;  %s1261_s12 = sshll.u32 %s308_s9, 2 }
  0x15   : > { %s1649_s15 = scalar_lea.vmem %s1851_s0, %s1257_s11  ;;  %s1651_s22 = sadd.s32 %s1262_s8, %s1261_s12 }
  0x16   : > { %v315_v5 = vld [vmem:[%s1649_s15] sm:$0xff]  ;;  %v316_v6 = vld [vmem:[%s1649_s15 + $0x8] sm:$0xff]  ;;  %v317_v7 = vld [vmem:[%s1649_s15 + $0x10] sm:$0x1]  ;;  %s299_s29 = sadd.s32 %s1480_s26, %s1479_s6  ;;  %s1263_s6 = sshll.u32 %s1651_s22, 3 }
  0x17   : > { %v343_v8 = vrot.slane %v315_v5, 1  ;;  %v344_v9 = vrot.slane %v316_v6, 1  ;;  %1410 = vmatprep.mubr.msk.f32.mxu1 %vm375_vm1, %v315_v5  ;;  %v346_v10 = vrot.slane %v317_v7, 1  ;;  %v1661_v11 = vld [vmem:[%s1649_s15 + $0x18] sm:$0xff]  ;;  %v1664_v12 = vld [vmem:[%s1649_s15 + $0x20] sm:$0xff]  ;;  %v1667_v13 = vld [vmem:[%s1649_s15 + $0x30] sm:$0xff]  ;;  %s1786_s12 = scalar_lea.vmem %s1855_s4, %s1263_s6 }
  0x18   : > { %1411 = vmatmul.mubr.msk.f32.vlgmr.msra.gmra.mxu1 %vm375_vm1, %v316_v6  ;;  %v348_v14 = vrot.slane %v1661_v11, 1  ;;  %v349_v15 = vrot.slane %v1664_v12, 1  ;;  %v320_v16 = vld [vmem:[%s1649_s15 + $0x28] sm:$0x1]  ;;  %v1674_v17 = vld [vmem:[%s1649_s15 + $0x38] sm:$0xff]  ;;  %v353_v18 = vrot.slane %v1667_v13, 1 }
  0x19   : > { %v345_v19 = vsel %vm342_vm2, %v343_v8, %v344_v9  ;;  %v347_v20 = vsel %vm342_vm2, %v344_v9, %v346_v10  ;;  %1437 = vmatpush3.msk.msra.mxu1 %vm392_vm0, %v1284_v3  ;;  %1413 = vmatprep.mubr.msk.f32.mxu1 %vm375_vm1, %v1661_v11  ;;  %v351_v21 = vrot.slane %v320_v16, 1  ;;  %v354_v22 = vrot.slane %v1674_v17, 1  ;;  %v323_v23 = vld [vmem:[%s1649_s15 + $0x40] sm:$0x1]  ;;  %v1687_v25 = vld [vmem:[%s1649_s15 + $0x48] sm:$0xff]  ;;  %v1690_v26 = vld [vmem:[%s1649_s15 + $0x50] sm:$0xff] }
  0x1a   : > { %1396 = vmatprep.mubr.msk.f32.mxu0 %vm375_vm1, %v345_v19  ;;  %v350_v24 = vsel %vm342_vm2, %v348_v14, %v349_v15  ;;  %1464 = vmatprep.subr.msk.mxu1 %vm392_vm0, %v1314_v4  ;;  %v356_v29 = vrot.slane %v323_v23, 1  ;;  %v358_v31 = vrot.slane %v1687_v25, 1  ;;  %v359_v32 = vrot.slane %v1690_v26, 1  ;;  %v326_v33 = vld [vmem:[%s1649_s15 + $0x58] sm:$0x1]  ;;  %s1259_s30 = sshll.u32 %s299_s29, 3 }
  0x1b   : > { %1397 = vmatmul.mubr.msk.f32.vlgmr.msra.gmra.mxu0 %vm375_vm1, %v347_v20  ;;  %v352_v28 = vsel %vm342_vm2, %v349_v15, %v351_v21  ;;  %v355_v30 = vsel %vm342_vm2, %v353_v18, %v354_v22  ;;  %v361_v35 = vrot.slane %v326_v33, 1  ;;  %s301_s16 = scalar_lea.vmem %s1852_s1, %s1259_s30 }
  0x1c   : > { %1423 = vmatpush3.msk.msra.mxu0 %vm392_vm0, %v1285_v2  ;;  %1399 = vmatprep.mubr.msk.f32.mxu0 %vm375_vm1, %v350_v24  ;;  %v357_v34 = vsel %vm342_vm2, %v354_v22, %v356_v29  ;;  %v360_v36 = vsel %vm342_vm2, %v358_v31, %v359_v32  ;;  %v327_v38 = vld [vmem:[%s301_s16] sm:$0xff]  ;;  %v328_v39 = vld [vmem:[%s301_s16 + $0x8] sm:$0xff]  ;;  %v329_v40 = vld [vmem:[%s301_s16 + $0x10] sm:$0x1] }
  0x1d   : > { %1414 = vmatmul.mubr.msk.f32.gmra.mxu1 %vm375_vm1, %v1664_v12  ;;  %1450 = vmatprep.subr.msk.mxu0 %vm392_vm0, %v1304_v27  ;;  %v362_v37 = vsel %vm342_vm2, %v359_v32, %v361_v35  ;;  %v366_v41 = vrot.slane %v327_v38, 1  ;;  %v367_v42 = vrot.slane %v328_v39, 1  ;;  %v369_v43 = vrot.slane %v329_v40, 1 }
  0x1e   : > { %1416 = vmatprep.mubr.msk.f32.mxu1 %vm375_vm1, %v1667_v13 }
  0x1f   : > { %1400 = vmatmul.mubr.msk.f32.gmra.mxu0 %vm375_vm1, %v352_v28  ;;  %v368_v44 = vsel %vm342_vm2, %v366_v41, %v367_v42  ;;  %v370_v45 = vsel %vm342_vm2, %v367_v42, %v369_v43 }
  0x20   : > { %1402 = vmatprep.mubr.msk.f32.mxu0 %vm375_vm1, %v355_v30 }
  0x21   : > { %1417 = vmatmul.mubr.msk.f32.gmra.mxu1 %vm375_vm1, %v1674_v17 }
  0x22   : > { %1419 = vmatprep.mubr.msk.f32.mxu1 %vm375_vm1, %v1687_v25 }
  0x23   : > { %1403 = vmatmul.mubr.msk.f32.gmra.mxu0 %vm375_vm1, %v357_v34 }
  0x24   : > { %1405 = vmatprep.mubr.msk.f32.mxu0 %vm375_vm1, %v360_v36 }
  0x25   : > { %1420 = vmatmul.mubr.msk.f32.gmra.mxu1 %vm375_vm1, %v1690_v26 }
  0x26   : > { %1438 = vmatprep.mubr.msk.f32.mxu1 %vm375_vm1, %v315_v5 }
  0x27   : > { %1406 = vmatmul.mubr.msk.f32.gmra.mxu0 %vm375_vm1, %v362_v37 }
  0x28   : > { %1424 = vmatprep.mubr.msk.f32.mxu0 %vm375_vm1, %v345_v19 }
  0x29   : > { %1439 = vmatmul.mubr.msk.f32.vlgmr.msra.gmra.mxu1 %vm375_vm1, %v316_v6 }
  0x2a   : > { %1465 = vmatpush3.msk.msra.mxu1 %vm392_vm0, %v1314_v4  ;;  %1441 = vmatprep.mubr.msk.f32.mxu1 %vm375_vm1, %v1661_v11 }
  0x2b   : > { %1425 = vmatmul.mubr.msk.f32.vlgmr.msra.gmra.mxu0 %vm375_vm1, %v347_v20 }
  0x2c   : > { %1451 = vmatpush3.msk.msra.mxu0 %vm392_vm0, %v1304_v27  ;;  %1427 = vmatprep.mubr.msk.f32.mxu0 %vm375_vm1, %v350_v24 }
  0x2d   : > { %1442 = vmatmul.mubr.msk.f32.gmra.mxu1 %vm375_vm1, %v1664_v12 }
  0x2e   : > { %1444 = vmatprep.mubr.msk.f32.mxu1 %vm375_vm1, %v1667_v13 }
  0x2f   : > { %1428 = vmatmul.mubr.msk.f32.gmra.mxu0 %vm375_vm1, %v352_v28 }
  0x30   : > { %1430 = vmatprep.mubr.msk.f32.mxu0 %vm375_vm1, %v355_v30 }
  0x31   : > { %1445 = vmatmul.mubr.msk.f32.gmra.mxu1 %vm375_vm1, %v1674_v17 }
  0x32   : > { %1447 = vmatprep.mubr.msk.f32.mxu1 %vm375_vm1, %v1687_v25 }
  0x33   : > { %1431 = vmatmul.mubr.msk.f32.gmra.mxu0 %vm375_vm1, %v357_v34 }
  0x34   : > { %1433 = vmatprep.mubr.msk.f32.mxu0 %vm375_vm1, %v360_v36 }
  0x35   : > { %1448 = vmatmul.mubr.msk.f32.gmra.mxu1 %vm375_vm1, %v1690_v26 }
  0x36   : > { %1466 = vmatprep.mubr.msk.f32.mxu1 %vm375_vm1, %v350_v24 }
  0x37   : > { %1434 = vmatmul.mubr.msk.f32.gmra.mxu0 %vm375_vm1, %v362_v37 }
  0x38   : > { %1452 = vmatprep.mubr.msk.f32.mxu0 %vm375_vm1, %v1661_v11 }
  0x39   : > { %1467 = vmatmul.mubr.msk.f32.vlgmr.msra.gmra.mxu1 %vm375_vm1, %v352_v28 }
  0x3a   : > { %1469 = vmatprep.mubr.msk.f32.mxu1 %vm375_vm1, %v355_v30 }
  0x3b   : > { %1453 = vmatmul.mubr.msk.f32.vlgmr.msra.gmra.mxu0 %vm375_vm1, %v1664_v12 }
  0x3c   : > { %1455 = vmatprep.mubr.msk.f32.mxu0 %vm375_vm1, %v1667_v13 }
  0x3d   : > { %1470 = vmatmul.mubr.msk.f32.gmra.mxu1 %vm375_vm1, %v357_v34 }
  0x3e   : > { %1472 = vmatprep.mubr.msk.f32.mxu1 %vm375_vm1, %v360_v36 }
  0x3f   : > { %1456 = vmatmul.mubr.msk.f32.gmra.mxu0 %vm375_vm1, %v1674_v17 }
  0x40   : > { %1458 = vmatprep.mubr.msk.f32.mxu0 %vm375_vm1, %v1687_v25 }
  0x41   : > { %1473 = vmatmul.mubr.msk.f32.gmra.mxu1 %vm375_vm1, %v362_v37 }
  0x42   : > { %1475 = vmatprep.mubr.msk.f32.mxu1 %vm375_vm1, %v368_v44 }
  0x43   : > { %1459 = vmatmul.mubr.msk.f32.gmra.mxu0 %vm375_vm1, %v1690_v26 }
  0x44   : > { %1461 = vmatprep.mubr.msk.f32.mxu0 %vm375_vm1, %v327_v38 }
  0x45   : > { %1476 = vmatmul.mubr.msk.f32.gmra.mxu1 %vm375_vm1, %v370_v45 }
  0x47   : > { %1462 = vmatmul.mubr.msk.f32.gmra.mxu0 %vm375_vm1, %v328_v39 }
  0xd8   : > { %v1412_v46 = vpop.f32.mrf.mxu1 }
  0xda   : > { %v586_v47 = vpop.f32.mrf.mxu1 }
  0xdb   : > { %v1398_v48 = vpop.f32.mrf.mxu0 }
  0xdc   : > { %v592_v50 = vadd.f32 %v1412_v46, %v1398_v48 }
  0xdd   : > { %v462_v51 = vpop.f32.mrf.mxu0  ;;  %v1415_v52 = vpop.f32.mrf.mxu1 }
  0xde   : > { %v632_v53 = vadd.f32 %v1781_v49, %v592_v50  ;;  %v587_v54 = vadd.f32 %v586_v47, %v462_v51 }
  0xdf   : > { %v1401_v55 = vpop.f32.mrf.mxu0  ;;  %v596_v56 = vpop.f32.mrf.mxu1 }
  0xe0   : > { %1113 = vst.msk [vmem:[%s1786_s12 + $0x8] sm:$0xff] %vm1111_vm3, %v632_v53  ;;  %v631_v57 = vadd.f32 %v1781_v49, %v587_v54  ;;  %v602_v58 = vadd.f32 %v1415_v52, %v1401_v55 }
  0xe1   : > { %v472_v59 = vpop.f32.mrf.mxu0  ;;  %v1418_v60 = vpop.f32.mrf.mxu1 }
  0xe2   : > { %1112 = vst.msk [vmem:[%s1786_s12] sm:$0xff] %vm1111_vm3, %v631_v57  ;;  %v634_v61 = vadd.f32 %v1781_v49, %v602_v58  ;;  %v597_v62 = vadd.f32 %v596_v56, %v472_v59 }
  0xe3   : > { %v1404_v63 = vpop.f32.mrf.mxu0  ;;  %v606_v0 = vpop.f32.mrf.mxu1 }
  0xe4   : > { %1115 = vst.msk [vmem:[%s1786_s12 + $0x28] sm:$0xff] %vm1111_vm3, %v634_v61  ;;  %v633_v1 = vadd.f32 %v1781_v49, %v597_v62  ;;  %v612_v2 = vadd.f32 %v1418_v60, %v1404_v63 }
  0xe5   : > { %v482_v3 = vpop.f32.mrf.mxu0  ;;  %v1421_v4 = vpop.f32.mrf.mxu1 }
  0xe6   : > { %1114 = vst.msk [vmem:[%s1786_s12 + $0x20] sm:$0xff] %vm1111_vm3, %v633_v1  ;;  %v636_v5 = vadd.f32 %v1781_v49, %v612_v2  ;;  %v607_v6 = vadd.f32 %v606_v0, %v482_v3 }
  0xe7   : > { %v1407_v7 = vpop.f32.mrf.mxu0  ;;  %v616_v8 = vpop.f32.mrf.mxu1 }
  0xe8   : > { %1117 = vst.msk [vmem:[%s1786_s12 + $0x48] sm:$0xff] %vm1111_vm3, %v636_v5  ;;  %v635_v9 = vadd.f32 %v1781_v49, %v607_v6  ;;  %v622_v10 = vadd.f32 %v1421_v4, %v1407_v7 }
  0xe9   : > { %v492_v11 = vpop.f32.mrf.mxu0  ;;  %v1440_v12 = vpop.f32.mrf.mxu1 }
  0xea   : > { %1116 = vst.msk [vmem:[%s1786_s12 + $0x40] sm:$0xff] %vm1111_vm3, %v635_v9  ;;  %v638_v13 = vadd.f32 %v1781_v49, %v622_v10  ;;  %v617_v14 = vadd.f32 %v616_v8, %v492_v11 }
  0xeb   : > { %v1426_v15 = vpop.f32.mrf.mxu0  ;;  %v820_v16 = vpop.f32.mrf.mxu1 }
  0xec   : > { %1119 = vst.msk [vmem:[%s1786_s12 + $0x68] sm:$0xff] %vm1111_vm3, %v638_v13  ;;  %v637_v17 = vadd.f32 %v1781_v49, %v617_v14  ;;  %v826_v32 = vadd.f32 %v1440_v12, %v1426_v15 }
  0xed   : > { %v712_v18 = vpop.f32.mrf.mxu0  ;;  %v1443_v19 = vpop.f32.mrf.mxu1 }
  0xee   : > { %1118 = vst.msk [vmem:[%s1786_s12 + $0x60] sm:$0xff] %vm1111_vm3, %v637_v17  ;;  %v821_v35 = vadd.f32 %v820_v16, %v712_v18 }
  0xef   : > { %v1429_v20 = vpop.f32.mrf.mxu0  ;;  %v830_v21 = vpop.f32.mrf.mxu1 }
  0xf0   : > { %v836_v39 = vadd.f32 %v1443_v19, %v1429_v20 }
  0xf1   : > { %v722_v22 = vpop.f32.mrf.mxu0  ;;  %v1446_v23 = vpop.f32.mrf.mxu1 }
  0xf2   : > { %v831_v44 = vadd.f32 %v830_v21, %v722_v22 }
  0xf3   : > { %v1432_v24 = vpop.f32.mrf.mxu0  ;;  %v840_v25 = vpop.f32.mrf.mxu1 }
  0xf4   : > { %v846_v51 = vadd.f32 %v1446_v23, %v1432_v24 }
  0xf5   : > { %v732_v26 = vpop.f32.mrf.mxu0  ;;  %v1449_v27 = vpop.f32.mrf.mxu1 }
  0xf6   : > { %v841_v57 = vadd.f32 %v840_v25, %v732_v26 }
  0xf7   : > { %v1435_v28 = vpop.f32.mrf.mxu0  ;;  %v850_v29 = vpop.f32.mrf.mxu1 }
  0xf8   : > { %v856_v62 = vadd.f32 %v1449_v27, %v1435_v28 }
  0xf9   : > { %v742_v30 = vpop.f32.mrf.mxu0  ;;  %v1468_v31 = vpop.f32.mrf.mxu1 }
  0xfa   : > { %v851_v4 = vadd.f32 %v850_v29, %v742_v30 }
  0xfb   : > { %v1454_v33 = vpop.f32.mrf.mxu0  ;;  %v1056_v34 = vpop.f32.mrf.mxu1 }
  0xfc   : > { %v974_v36 = vadd.f32 %v1454_v33, %v826_v32 }
  0xfd   : > { %v934_v37 = vpop.f32.mrf.mxu0  ;;  %v1471_v38 = vpop.f32.mrf.mxu1 }
  0xfe   : > { %v1096_v40 = vadd.f32 %v1468_v31, %v974_v36  ;;  %v973_v41 = vadd.f32 %v934_v37, %v821_v35 }
  0xff   : > { %v1457_v42 = vpop.f32.mrf.mxu0  ;;  %v1066_v43 = vpop.f32.mrf.mxu1 }
 0x100   : > { %v1104_v45 = vadd.f32 %v1781_v49, %v1096_v40  ;;  %v1095_v46 = vadd.f32 %v1056_v34, %v973_v41  ;;  %v976_v47 = vadd.f32 %v1457_v42, %v836_v39 }
 0x101   : > { %v944_v48 = vpop.f32.mrf.mxu0  ;;  %v1474_v50 = vpop.f32.mrf.mxu1 }
 0x102   : > { %1325 = vst.msk [vmem:[%s1786_s12 + $0x18] sm:$0xff] %vm1111_vm3, %v1104_v45  ;;  %v1103_v52 = vadd.f32 %v1781_v49, %v1095_v46  ;;  %v1098_v53 = vadd.f32 %v1471_v38, %v976_v47  ;;  %v975_v54 = vadd.f32 %v944_v48, %v831_v44 }
 0x103   : > { %v1460_v55 = vpop.f32.mrf.mxu0  ;;  %v1076_v56 = vpop.f32.mrf.mxu1 }
 0x104   : > { %1324 = vst.msk [vmem:[%s1786_s12 + $0x10] sm:$0xff] %vm1111_vm3, %v1103_v52  ;;  %v1106_v58 = vadd.f32 %v1781_v49, %v1098_v53  ;;  %v1097_v59 = vadd.f32 %v1066_v43, %v975_v54  ;;  %v978_v60 = vadd.f32 %v1460_v55, %v846_v51 }
 0x105   : > { %v954_v61 = vpop.f32.mrf.mxu0  ;;  %v1477_v3 = vpop.f32.mrf.mxu1 }
 0x106   : > { %1327 = vst.msk [vmem:[%s1786_s12 + $0x38] sm:$0xff] %vm1111_vm3, %v1106_v58  ;;  %v1105_v63 = vadd.f32 %v1781_v49, %v1097_v59  ;;  %v1100_v0 = vadd.f32 %v1474_v50, %v978_v60  ;;  %v977_v1 = vadd.f32 %v954_v61, %v841_v57 }
 0x107   : > { %v1463_v2 = vpop.f32.mrf.mxu0  ;;  %v1086_v12 = vpop.f32.mrf.mxu1 }
 0x108   : > { %1326 = vst.msk [vmem:[%s1786_s12 + $0x30] sm:$0xff] %vm1111_vm3, %v1105_v63  ;;  %v1108_v5 = vadd.f32 %v1781_v49, %v1100_v0  ;;  %v1099_v6 = vadd.f32 %v1076_v56, %v977_v1  ;;  %v980_v7 = vadd.f32 %v1463_v2, %v856_v62 }
 0x109   : > { %v964_v8 = vpop.f32.mrf.mxu0 }
 0x10a   : > { %1329 = vst.msk [vmem:[%s1786_s12 + $0x58] sm:$0xff] %vm1111_vm3, %v1108_v5  ;;  %v1107_v9 = vadd.f32 %v1781_v49, %v1099_v6  ;;  %v1102_v10 = vadd.f32 %v1477_v3, %v980_v7  ;;  %v979_v11 = vadd.f32 %v964_v8, %v851_v4 }
 0x10c   : > { %1328 = vst.msk [vmem:[%s1786_s12 + $0x50] sm:$0xff] %vm1111_vm3, %v1107_v9  ;;  %v1110_v13 = vadd.f32 %v1781_v49, %v1102_v10  ;;  %v1101_v14 = vadd.f32 %v1086_v12, %v979_v11 }
 0x10e   : > { %1331 = vst.msk [vmem:[%s1786_s12 + $0x78] sm:$0xff] %vm1111_vm3, %v1110_v13  ;;  %v1109_v15 = vadd.f32 %v1781_v49, %v1101_v14 }
 0x110   : > { %1330 = vst.msk [vmem:[%s1786_s12 + $0x70] sm:$0xff] %vm1111_vm3, %v1109_v15 }
 0x111 PF: > { %s14_s19 = sadd.s32 1, %s1559_s19   ;;  %s1856_s15 = smov %s1551_s17 }
 0x112   : > { %p11_p9 = scmp.ge.s32.totalorder %s14_s19, 10   ;;  %s1857_s16 = smov %s1555_s18 }
 0x113   : > { %s1858_s17 = smov %s1861_s20  ;;  %s1859_s18 = smov %s1865_s21 }
 0x114   :  { %13 = sbr.rel (!%p11_p9) target bundleno = 3 (0x3), region = 75 }

// kernel: upsample_pallas.3
= control target key start
LH: loop header
LB: loop body
LE: loop exit
PB: predicated region body
PF: predicated region fallthrough
CT: control target
= control target key end

     0   :  { %s3198_s15 = smov 0   ;;  %s3200_s16 = smov 0   ;;  %s4341_s0 = inlined_call_operand.vmem [shape: f32[2,33,33,4], index: 0, kind: input, shape index: {}, may-alias: {0,1}]   ;;  %s4342_s1 = inlined_call_operand.vmem [shape: f32[2,33,33,4], index: 1, kind: input, shape index: {}, may-alias: {0,1}]   ;;  %s4343_s2 = inlined_call_operand.vmem [shape: f32[6,4,8], index: 2, kind: input, shape index: {}]   ;;  %s4344_s3 = inlined_call_operand.vmem [shape: f32[1,8], index: 3, kind: input, shape index: {}]   ;;  %s4345_s4 = inlined_call_operand.vmem [shape: f32[2,32,2,32,8], index: 4, kind: output, shape index: {}]  }
   0x1   :  { %s3202_s17 = smov 0   ;;  %s3204_s18 = smov 0  }
   0x2   :  { %s3206_s19 = smov 0  }
   0x3 LB: > { %s23_s20 = sadd.s32 1, %s3163_s17  ;;  %s26_s21 = sadd.s32 1, %s3167_s18  ;;  %s3171_s19 = sphi %s3206_s19, %s14_s19   ;;  %s3167_s18 = sphi %s3204_s18, %s4440_s18   ;;  %s3163_s17 = sphi %s3202_s17, %s4439_s17   ;;  %s3159_s16 = sphi %s3200_s16, %s4438_s16   ;;  %s3155_s15 = sphi %s3198_s15, %s4437_s15  }
   0x4   : > { %p24_p0 = scmp.ge.s32.totalorder %s23_s20, 4  ;;  %p2339_p1 = scmp.ge.s32.totalorder %s3171_s19, 1 }
   0x5   : > { %p218_p2 = scmp.lt.s32.totalorder %s3171_s19, 9 }
   0x6   : > { %s4442_s20 = smov (%p24_p0, %s23_s20), 0  ;;  %s4444_s21 = smov (!%p24_p0, %s26_s21), %s3167_s18 }
   0x7   : > { %p219_p3 = pnand %p2339_p1, %p218_p2  ;;  %p28_p4 = scmp.ge.s32.totalorder %s4444_s21, 2 }
   0x9   : > { %s4446_s21 = smov (%p28_p4, %s4444_s21), 0  ;;  %222 = sbr.rel (%p219_p3) target bundleno = 420 (0x1a4), region = 36 }
   0xe   : > { %v2348_v0 = vld [vmem:[%s4343_s2 + $0x4] sm:$0xf]  ;;  %vm556_vm0 = vcmask 1043456   ;;  %v488_v1 = vld [vmem:[%s4343_s2] sm:$0xf]  ;;  %s3234_s26 = sshll.u32 %s3155_s15, 3 }
   0xf   : > { %2790 = vmatprep.subr.msk.mxu0 %vm556_vm0, %v2348_v0  ;;  %2840 = vmatprep.subr.msk.mxu1 %vm556_vm0, %v488_v1  ;;  %p276_p5 = scmp.lt.s32.totalorder %s3159_s16, 1  ;;  %p278_p6 = scmp.lt.s32.totalorder %s3234_s26, 32  ;;  %v2417_v2 = vld [vmem:[%s4343_s2 + $0xc] sm:$0xf]  ;;  %v2416_v3 = vld [vmem:[%s4343_s2 + $0x8] sm:$0xf] }
  0x10   : > { %2791 = vmatpush3.msk.msra.mxu0 %vm556_vm0, %v2348_v0  ;;  %p307_p7 = scmp.lt.s32.totalorder %s3234_s26, 31  ;;  %2841 = vmatpush3.msk.msra.mxu1 %vm556_vm0, %v488_v1  ;;  %vm491_vm1 = vcmask 31744   ;;  %v3268_v4 = vld [vmem:[%s4343_s2 + $0x14] sm:$0xf]  ;;  %vm400_vm2 = vcmask 1046528   ;;  %s2591_s28 = sadd.s32 8, %s3234_s26 }
  0x11   : > { %s4448_s16 = smov (!%p276_p5, %s3159_s16), 1  ;;  %2890 = vmatprep.subr.msk.mxu0 %vm556_vm0, %v2417_v2  ;;  %2940 = vmatprep.subr.msk.mxu1 %vm556_vm0, %v2416_v3  ;;  %v3322_v24 = vld [vmem:[%s4343_s2 + $0x10] sm:$0xf]  ;;  %p295_p8 = scmp.lt.s32.totalorder %s2591_s28, 32  ;;  %vm2147_vm3 = vcmask 64512  }
  0x12   : > { %s279_s5 = scalar_select %p278_p6, %s3234_s26, 32 }
  0x13   : > { %s3091_s6 = smul.u32 165, %s4448_s16  ;;  %s2346_s8 = sshll.u32 %s4448_s16, 8 }
  0x14   : > { %s3090_s7 = smul.u32 5, %s279_s5  ;;  %s4450_s28 = smov (!%p295_p8, %s2591_s28), 32 }
  0x15   : > { %s308_s9 = scalar_select %p307_p7, %s3234_s26, 31 }
  0x16   : > { %s282_s10 = sadd.s32 %s3091_s6, %s3090_s7  ;;  %s3092_s26 = smul.u32 5, %s4450_s28 }
  0x17   : > { %s2341_s11 = sshll.u32 %s282_s10, 3  ;;  %s2345_s12 = sshll.u32 %s308_s9, 3 }
  0x18   : > { %s3261_s15 = scalar_lea.vmem %s4341_s0, %s2341_s11  ;;  %s3263_s22 = sadd.s32 %s2346_s8, %s2345_s12 }
  0x19   : > { %v3271_v5 = vld [vmem:[%s3261_s15] sm:$0xff]  ;;  %v3274_v6 = vld [vmem:[%s3261_s15 + $0x8] sm:$0xff]  ;;  %v3277_v7 = vld [vmem:[%s3261_s15 + $0x10] sm:$0xff]  ;;  %s299_s29 = sadd.s32 %s3092_s26, %s3091_s6  ;;  %s2347_s7 = sshll.u32 %s3263_s22, 3 }
  0x1a   : > { %v401_v8 = vrot.slane %v3271_v5, 1  ;;  %v402_v9 = vrot.slane %v3274_v6, 1  ;;  %2842 = vmatprep.mubr.msk.f32.mxu1 %vm491_vm1, %v3271_v5  ;;  %v404_v10 = vrot.slane %v3277_v7, 1  ;;  %v3285_v11 = vld [vmem:[%s3261_s15 + $0x18] sm:$0xff]  ;;  %v319_v12 = vld [vmem:[%s3261_s15 + $0x20] sm:$0x1]  ;;  %s3940_s12 = scalar_lea.vmem %s4345_s4, %s2347_s7 }
  0x1b   : > { %2843 = vmatmul.mubr.msk.f32.vlgmr.msra.gmra.mxu1 %vm491_vm1, %v3274_v6  ;;  %v406_v13 = vrot.slane %v3285_v11, 1  ;;  %v408_v14 = vrot.slane %v319_v12, 1  ;;  %v3292_v15 = vld [vmem:[%s3261_s15 + $0x28] sm:$0xff]  ;;  %v3295_v16 = vld [vmem:[%s3261_s15 + $0x30] sm:$0xff]  ;;  %v3309_v21 = vld [vmem:[%s3261_s15 + $0x38] sm:$0xff]  ;;  %s2343_s30 = sshll.u32 %s299_s29, 3 }
  0x1c   : > { %v3298_v17 = vsel %vm400_vm2, %v401_v8, %v402_v9  ;;  %v3301_v18 = vsel %vm400_vm2, %v402_v9, %v404_v10  ;;  %2941 = vmatpush3.msk.msra.mxu1 %vm556_vm0, %v2416_v3  ;;  %2845 = vmatprep.mubr.msk.f32.mxu1 %vm491_vm1, %v3277_v7  ;;  %v410_v19 = vrot.slane %v3292_v15, 1  ;;  %v411_v20 = vrot.slane %v3295_v16, 1  ;;  %v3317_v23 = vld [vmem:[%s3261_s15 + $0x40] sm:$0xff]  ;;  %v324_v29 = vld [vmem:[%s3261_s15 + $0x48] sm:$0x1]  ;;  %v3347_v30 = vld [vmem:[%s3261_s15 + $0x50] sm:$0xff]  ;;  %s301_s6 = scalar_lea.vmem %s4342_s1, %s2343_s30 }
  0x1d   : > { %2792 = vmatprep.mubr.msk.f32.mxu0 %vm491_vm1, %v3298_v17  ;;  %v3314_v22 = vsel %vm400_vm2, %v404_v10, %v406_v13  ;;  %3040 = vmatprep.subr.msk.mxu1 %vm556_vm0, %v3268_v4  ;;  %v3332_v25 = vsel %vm400_vm2, %v406_v13, %v408_v14  ;;  %v413_v26 = vrot.slane %v3309_v21, 1  ;;  %v415_v28 = vrot.slane %v3317_v23, 1  ;;  %v3350_v31 = vld [vmem:[%s3261_s15 + $0x58] sm:$0xff]  ;;  %v3367_v37 = vld [vmem:[%s3261_s15 + $0x60] sm:$0xff]  ;;  %v3372_v38 = vld [vmem:[%s3261_s15 + $0x68] sm:$0xff] }
  0x1e   : > { %2793 = vmatmul.mubr.msk.f32.vlgmr.msra.gmra.mxu0 %vm491_vm1, %v3301_v18  ;;  %v3338_v27 = vsel %vm400_vm2, %v410_v19, %v411_v20  ;;  %v417_v33 = vrot.slane %v324_v29, 1  ;;  %v419_v35 = vrot.slane %v3347_v30, 1  ;;  %v420_v36 = vrot.slane %v3350_v31, 1  ;;  %v329_v43 = vld [vmem:[%s3261_s15 + $0x70] sm:$0x1]  ;;  %v3392_v44 = vld [vmem:[%s3261_s15 + $0x78] sm:$0xff] }
  0x1f   : > { %2891 = vmatpush3.msk.msra.mxu0 %vm556_vm0, %v2417_v2  ;;  %2795 = vmatprep.mubr.msk.f32.mxu0 %vm491_vm1, %v3314_v22  ;;  %v3357_v32 = vsel %vm400_vm2, %v411_v20, %v413_v26  ;;  %v3362_v34 = vsel %vm400_vm2, %v413_v26, %v415_v28  ;;  %v422_v40 = vrot.slane %v3367_v37, 1  ;;  %v424_v42 = vrot.slane %v3372_v38, 1  ;;  %v3395_v45 = vld [vmem:[%s3261_s15 + $0x80] sm:$0xff]  ;;  %v3412_v51 = vld [vmem:[%s3261_s15 + $0x88] sm:$0xff]  ;;  %v3417_v52 = vld [vmem:[%s3261_s15 + $0x90] sm:$0xff] }
  0x20   : > { %2846 = vmatmul.mubr.msk.f32.gmra.mxu1 %vm491_vm1, %v3285_v11  ;;  %2990 = vmatprep.subr.msk.mxu0 %vm556_vm0, %v3322_v24  ;;  %v3379_v39 = vsel %vm400_vm2, %v415_v28, %v417_v33  ;;  %v3385_v41 = vsel %vm400_vm2, %v419_v35, %v420_v36  ;;  %v426_v47 = vrot.slane %v329_v43, 1  ;;  %v428_v49 = vrot.slane %v3392_v44, 1  ;;  %v334_v57 = vld [vmem:[%s3261_s15 + $0x98] sm:$0x1]  ;;  %v3437_v58 = vld [vmem:[%s3261_s15 + $0xa0] sm:$0xff]  ;;  %v3440_v59 = vld [vmem:[%s3261_s15 + $0xa8] sm:$0xff] }
  0x21   : > { %2848 = vmatprep.mubr.msk.f32.mxu1 %vm491_vm1, %v3292_v15  ;;  %v3402_v46 = vsel %vm400_vm2, %v420_v36, %v422_v40  ;;  %v3407_v48 = vsel %vm400_vm2, %v422_v40, %v424_v42  ;;  %v429_v50 = vrot.slane %v3395_v45, 1  ;;  %v431_v54 = vrot.slane %v3412_v51, 1  ;;  %v3457_v1 = vld [vmem:[%s3261_s15 + $0xb0] sm:$0xff]  ;;  %v3462_v2 = vld [vmem:[%s3261_s15 + $0xb8] sm:$0xff]  ;;  %v339_v12 = vld [vmem:[%s3261_s15 + $0xc0] sm:$0x1] }
  0x22   : > { %2796 = vmatmul.mubr.msk.f32.gmra.mxu0 %vm491_vm1, %v3332_v25  ;;  %v3424_v53 = vsel %vm400_vm2, %v424_v42, %v426_v47  ;;  %v433_v56 = vrot.slane %v3417_v52, 1  ;;  %v435_v61 = vrot.slane %v334_v57, 1  ;;  %v437_v63 = vrot.slane %v3437_v58, 1  ;;  %v3482_v13 = vld [vmem:[%s3261_s15 + $0xc8] sm:$0xff]  ;;  %v3485_v14 = vld [vmem:[%s3261_s15 + $0xd0] sm:$0xff]  ;;  %v3502_v33 = vld [vmem:[%s3261_s15 + $0xd8] sm:$0xff] }
  0x23   : > { %2798 = vmatprep.mubr.msk.f32.mxu0 %vm491_vm1, %v3338_v27  ;;  %v3430_v55 = vsel %vm400_vm2, %v428_v49, %v429_v50  ;;  %v3447_v60 = vsel %vm400_vm2, %v429_v50, %v431_v54  ;;  %v438_v0 = vrot.slane %v3440_v59, 1  ;;  %v440_v8 = vrot.slane %v3457_v1, 1  ;;  %v3507_v35 = vld [vmem:[%s3261_s15 + $0xe0] sm:$0xff]  ;;  %v344_v47 = vld [vmem:[%s3261_s15 + $0xe8] sm:$0x1]  ;;  %v3527_v49 = vld [vmem:[%s3261_s15 + $0xf0] sm:$0xff] }
  0x24   : > { %2849 = vmatmul.mubr.msk.f32.gmra.mxu1 %vm491_vm1, %v3295_v16  ;;  %v3452_v62 = vsel %vm400_vm2, %v431_v54, %v433_v56  ;;  %v3469_v3 = vsel %vm400_vm2, %v433_v56, %v435_v61  ;;  %v442_v10 = vrot.slane %v3462_v2, 1  ;;  %v444_v20 = vrot.slane %v339_v12, 1  ;;  %4373 = vst [vmem:[#allocation2_spill] sm:$0xff] %v3507_v35  ;;  %4374 = vst [vmem:[#allocation3_spill] sm:$0xff] %v3527_v49  ;;  %v3530_v50 = vld [vmem:[%s3261_s15 + $0xf8] sm:$0xff] }
  0x25   : > { %2851 = vmatprep.mubr.msk.f32.mxu1 %vm491_vm1, %v3309_v21  ;;  %v3475_v9 = vsel %vm400_vm2, %v437_v63, %v438_v0  ;;  %v3492_v19 = vsel %vm400_vm2, %v438_v0, %v440_v8  ;;  %v446_v28 = vrot.slane %v3482_v13, 1  ;;  %v447_v29 = vrot.slane %v3485_v14, 1  ;;  %4375 = vst [vmem:[#allocation4_spill] sm:$0xff] %v3530_v50  ;;  %v3547_v0 = vld [vmem:[%s3261_s15 + $0x100] sm:$0xff] }
  0x26   : > { %2799 = vmatmul.mubr.msk.f32.gmra.mxu0 %vm491_vm1, %v3357_v32  ;;  %v3497_v26 = vsel %vm400_vm2, %v440_v8, %v442_v10  ;;  %v3514_v36 = vsel %vm400_vm2, %v442_v10, %v444_v20  ;;  %v449_v40 = vrot.slane %v3502_v33, 1  ;;  %v451_v43 = vrot.slane %v3507_v35, 1  ;;  %4377 = vst [vmem:[#allocation6_spill] sm:$0xff] %v3547_v0  ;;  %v3552_v8 = vld [vmem:[%s3261_s15 + $0x108] sm:$0xff] }
  0x27   : > { %2801 = vmatprep.mubr.msk.f32.mxu0 %vm491_vm1, %v3362_v34  ;;  %v3520_v42 = vsel %vm400_vm2, %v446_v28, %v447_v29  ;;  %v453_v56 = vrot.slane %v344_v47, 1  ;;  %v455_v61 = vrot.slane %v3527_v49, 1  ;;  %v456_v63 = vrot.slane %v3530_v50, 1  ;;  %4378 = vst [vmem:[#allocation7_spill] sm:$0xff] %v3552_v8 }
  0x28   : > { %2852 = vmatmul.mubr.msk.f32.gmra.mxu1 %vm491_vm1, %v3317_v23  ;;  %v3537_v54 = vsel %vm400_vm2, %v447_v29, %v449_v40  ;;  %v3542_v57 = vsel %vm400_vm2, %v449_v40, %v451_v43  ;;  %v458_v12 = vrot.slane %v3547_v0, 1  ;;  %v460_v28 = vrot.slane %v3552_v8, 1  ;;  %v349_v29 = vld [vmem:[%s3261_s15 + $0x110] sm:$0x1]  ;;  %v3573_v40 = vld [vmem:[%s3261_s15 + $0x118] sm:$0xff] }
  0x29   : > { %2854 = vmatprep.mubr.msk.f32.mxu1 %vm491_vm1, %v3347_v30  ;;  %4376 = vst [vmem:[#allocation5_spill] sm:$0xff] %v3542_v57  ;;  %v3559_v10 = vsel %vm400_vm2, %v451_v43, %v453_v56  ;;  %v3566_v20 = vsel %vm400_vm2, %v455_v61, %v456_v63  ;;  %4381 = vst [vmem:[#allocation10_spill] sm:$0xff] %v3573_v40  ;;  %v3576_v43 = vld [vmem:[%s3261_s15 + $0x120] sm:$0xff]  ;;  %v462_v56 = vrot.slane %v349_v29, 1 }
  0x2a   : > { %2802 = vmatmul.mubr.msk.f32.gmra.mxu0 %vm491_vm1, %v3379_v39  ;;  %4379 = vst [vmem:[#allocation8_spill] sm:$0xff] %v3559_v10  ;;  %4380 = vst [vmem:[#allocation9_spill] sm:$0xff] %v3566_v20  ;;  %v3583_v47 = vsel %vm400_vm2, %v456_v63, %v458_v12  ;;  %v3588_v61 = vsel %vm400_vm2, %v458_v12, %v460_v28  ;;  %v3598_v63 = vld [vmem:[%s3261_s15 + $0x130] sm:$0xff] }
  0x2b   : > { %2804 = vmatprep.mubr.msk.f32.mxu0 %vm491_vm1, %v3385_v41  ;;  %4382 = vst [vmem:[#allocation11_spill] sm:$0xff] %v3583_v47  ;;  %4383 = vst [vmem:[#allocation12_spill] sm:$0xff] %v3588_v61  ;;  %v3607_v12 = vsel %vm400_vm2, %v460_v28, %v462_v56  ;;  %v3622_v28 = vld [vmem:[%s301_s6] sm:$0xff]  ;;  %v3624_v56 = vld [vmem:[%s301_s6 + $0x8] sm:$0xff] }
  0x2c   : > { %2855 = vmatmul.mubr.msk.f32.gmra.mxu1 %vm491_vm1, %v3350_v31  ;;  %4384 = vst [vmem:[#allocation13_spill] sm:$0xff] %v3607_v12  ;;  %4385 = vst [vmem:[#allocation14_spill] sm:$0xff] %v3622_v28 }
  0x2d   : > { %2857 = vmatprep.mubr.msk.f32.mxu1 %vm491_vm1, %v3367_v37  ;;  %4386 = vst [vmem:[#allocation15_spill] sm:$0xff] %v3624_v56 }
  0x2e   : > { %2805 = vmatmul.mubr.msk.f32.gmra.mxu0 %vm491_vm1, %v3402_v46 }
  0x2f   : > { %2807 = vmatprep.mubr.msk.f32.mxu0 %vm491_vm1, %v3407_v48 }
  0x30   : > { %2858 = vmatmul.mubr.msk.f32.gmra.mxu1 %vm491_vm1, %v3372_v38 }
  0x31   : > { %2860 = vmatprep.mubr.msk.f32.mxu1 %vm491_vm1, %v3392_v44 }
  0x32   : > { %2808 = vmatmul.mubr.msk.f32.gmra.mxu0 %vm491_vm1, %v3424_v53 }
  0x33   : > { %2810 = vmatprep.mubr.msk.f32.mxu0 %vm491_vm1, %v3430_v55 }
  0x34   : > { %2861 = vmatmul.mubr.msk.f32.gmra.mxu1 %vm491_vm1, %v3395_v45 }
  0x35   : > { %2863 = vmatprep.mubr.msk.f32.mxu1 %vm491_vm1, %v3412_v51 }
  0x36   : > { %2811 = vmatmul.mubr.msk.f32.gmra.mxu0 %vm491_vm1, %v3447_v60 }
  0x37   : > { %2813 = vmatprep.mubr.msk.f32.mxu0 %vm491_vm1, %v3452_v62 }
  0x38   : > { %2864 = vmatmul.mubr.msk.f32.gmra.mxu1 %vm491_vm1, %v3417_v52 }
  0x39   : > { %2866 = vmatprep.mubr.msk.f32.mxu1 %vm491_vm1, %v3437_v58 }
  0x3a   : > { %2814 = vmatmul.mubr.msk.f32.gmra.mxu0 %vm491_vm1, %v3469_v3 }
  0x3b   : > { %2816 = vmatprep.mubr.msk.f32.mxu0 %vm491_vm1, %v3475_v9 }
  0x3c   : > { %2867 = vmatmul.mubr.msk.f32.gmra.mxu1 %vm491_vm1, %v3440_v59 }
  0x3d   : > { %2869 = vmatprep.mubr.msk.f32.mxu1 %vm491_vm1, %v3457_v1 }
  0x3e   : > { %2817 = vmatmul.mubr.msk.f32.gmra.mxu0 %vm491_vm1, %v3492_v19 }
  0x3f   : > { %2819 = vmatprep.mubr.msk.f32.mxu0 %vm491_vm1, %v3497_v26 }
  0x40   : > { %2870 = vmatmul.mubr.msk.f32.gmra.mxu1 %vm491_vm1, %v3462_v2 }
  0x41   : > { %2872 = vmatprep.mubr.msk.f32.mxu1 %vm491_vm1, %v3482_v13 }
  0x42   : > { %2820 = vmatmul.mubr.msk.f32.gmra.mxu0 %vm491_vm1, %v3514_v36 }
  0x43   : > { %2822 = vmatprep.mubr.msk.f32.mxu0 %vm491_vm1, %v3520_v42 }
  0x44   : > { %2873 = vmatmul.mubr.msk.f32.gmra.mxu1 %vm491_vm1, %v3485_v14 }
  0x45   : > { %2875 = vmatprep.mubr.msk.f32.mxu1 %vm491_vm1, %v3502_v33 }
  0x46   : > { %2823 = vmatmul.mubr.msk.f32.gmra.mxu0 %vm491_vm1, %v3537_v54 }
  0x47   : > { %2825 = vmatprep.mubr.msk.f32.mxu0 %vm491_vm1, %v3542_v57 }
  0x48   : > { %2876 = vmatmul.mubr.msk.f32.gmra.mxu1 %vm491_vm1, %v3507_v35  ;;  %v465_v35 = vrot.slane %v3576_v43, 1 }
  0x49   : > { %2878 = vmatprep.mubr.msk.f32.mxu1 %vm491_vm1, %v3527_v49  ;;  %v464_v49 = vrot.slane %v3573_v40, 1 }
  0x4a   : > { %2826 = vmatmul.mubr.msk.f32.gmra.mxu0 %vm491_vm1, %v3559_v10  ;;  %v3593_v10 = vld [vmem:[%s3261_s15 + $0x128] sm:$0xff] }
  0x4b   : > { %2828 = vmatprep.mubr.msk.f32.mxu0 %vm491_vm1, %v3566_v20  ;;  %v467_v29 = vrot.slane %v3593_v10, 1 }
  0x4c   : > { %2879 = vmatmul.mubr.msk.f32.gmra.mxu1 %vm491_vm1, %v3530_v50  ;;  %v469_v50 = vrot.slane %v3598_v63, 1 }
  0x4d   : > { %2881 = vmatprep.mubr.msk.f32.mxu1 %vm491_vm1, %v3547_v0  ;;  %v3613_v0 = vsel %vm400_vm2, %v464_v49, %v465_v35  ;;  %v478_v49 = vrot.slane %v3622_v28, 1  ;;  %v3635_v20 = vsel %vm400_vm2, %v465_v35, %v467_v29  ;;  %v3651_v35 = vld [vmem:[%s301_s6 + $0x18] sm:$0xff] }
  0x4e   : > { %2829 = vmatmul.mubr.msk.f32.gmra.mxu0 %vm491_vm1, %v3583_v47  ;;  %v354_v47 = vld [vmem:[%s3261_s15 + $0x138] sm:$0x1] }
  0x4f   : > { %2831 = vmatprep.mubr.msk.f32.mxu0 %vm491_vm1, %v3588_v61  ;;  %v3630_v61 = vld [vmem:[%s301_s6 + $0x10] sm:$0xff] }
  0x50   : > { %2882 = vmatmul.mubr.msk.f32.gmra.mxu1 %vm491_vm1, %v3552_v8  ;;  %v479_v8 = vrot.slane %v3624_v56, 1  ;;  %4387 = vst [vmem:[#allocation16_spill] sm:$0xff] %v3630_v61  ;;  %v481_v57 = vrot.slane %v3630_v61, 1  ;;  %v359_v61 = vld [vmem:[%s301_s6 + $0x20] sm:$0x1] }
  0x51   : > { %2884 = vmatprep.mubr.msk.f32.mxu1 %vm491_vm1, %v3573_v40  ;;  %v471_v40 = vrot.slane %v354_v47, 1  ;;  %v483_v47 = vrot.slane %v3651_v35, 1 }
  0x52   : > { %2832 = vmatmul.mubr.msk.f32.gmra.mxu0 %vm491_vm1, %v3607_v12  ;;  %v3641_v12 = vsel %vm400_vm2, %v467_v29, %v469_v50  ;;  %v3644_v28 = vsel %vm400_vm2, %v478_v49, %v479_v8  ;;  %v3649_v56 = vsel %vm400_vm2, %v479_v8, %v481_v57  ;;  %v485_v49 = vrot.slane %v359_v61, 1 }
  0x53   : > { %2834 = vmatprep.mubr.msk.f32.mxu0 %vm491_vm1, %v3613_v0  ;;  %4388 = vst [vmem:[#allocation17_spill] sm:$0xff] %v3649_v56  ;;  %v3659_v29 = vsel %vm400_vm2, %v469_v50, %v471_v40  ;;  %v3664_v8 = vsel %vm400_vm2, %v481_v57, %v483_v47  ;;  %v4399_v50 = vld [vmem:[#allocation10_spill] sm:$0xff]  ;;  %v4400_v57 = vld [vmem:[#allocation13_spill] sm:$0xff] }
  0x54   : > { %2885 = vmatmul.mubr.msk.f32.gmra.mxu1 %vm491_vm1, %v3576_v43  ;;  %v3669_v56 = vsel %vm400_vm2, %v483_v47, %v485_v49 }
  0x55   : > { %2887 = vmatprep.mubr.msk.f32.mxu1 %vm491_vm1, %v3593_v10 }
  0x56   : > { %2835 = vmatmul.mubr.msk.f32.gmra.mxu0 %vm491_vm1, %v3635_v20 }
  0x57   : > { %2837 = vmatprep.mubr.msk.f32.mxu0 %vm491_vm1, %v3641_v12 }
  0x58   : > { %2888 = vmatmul.mubr.msk.f32.gmra.mxu1 %vm491_vm1, %v3598_v63 }
  0x59   : > { %2942 = vmatprep.mubr.msk.f32.mxu1 %vm491_vm1, %v3271_v5  ;;  %v4390_v5 = vld [vmem:[#allocation2_spill] sm:$0xff] }
  0x5a   : > { %2838 = vmatmul.mubr.msk.f32.gmra.mxu0 %vm491_vm1, %v3659_v29 }
  0x5b   : > { %2892 = vmatprep.mubr.msk.f32.mxu0 %vm491_vm1, %v3298_v17  ;;  %v4394_v17 = vld [vmem:[#allocation4_spill] sm:$0xff] }
  0x5c   : > { %2943 = vmatmul.mubr.msk.f32.vlgmr.msra.gmra.mxu1 %vm491_vm1, %v3274_v6  ;;  %v4391_v6 = vld [vmem:[#allocation3_spill] sm:$0xff] }
  0x5d   : > { %3041 = vmatpush3.msk.msra.mxu1 %vm556_vm0, %v3268_v4  ;;  %2945 = vmatprep.mubr.msk.f32.mxu1 %vm491_vm1, %v3277_v7  ;;  %v4389_v4 = vld [vmem:[#allocation5_spill] sm:$0xff]  ;;  %v4392_v7 = vld [vmem:[#allocation8_spill] sm:$0xff] }
  0x5e   : > { %2893 = vmatmul.mubr.msk.f32.vlgmr.msra.gmra.mxu0 %vm491_vm1, %v3301_v18  ;;  %v4395_v18 = vld [vmem:[#allocation6_spill] sm:$0xff] }
  0x5f   : > { %2991 = vmatpush3.msk.msra.mxu0 %vm556_vm0, %v3322_v24  ;;  %2895 = vmatprep.mubr.msk.f32.mxu0 %vm491_vm1, %v3314_v22  ;;  %v4396_v22 = vld [vmem:[#allocation11_spill] sm:$0xff]  ;;  %v4397_v24 = vld [vmem:[#allocation12_spill] sm:$0xff] }
  0x60   : > { %2946 = vmatmul.mubr.msk.f32.gmra.mxu1 %vm491_vm1, %v3285_v11  ;;  %v4393_v11 = vld [vmem:[#allocation9_spill] sm:$0xff] }
  0x61   : > { %2948 = vmatprep.mubr.msk.f32.mxu1 %vm491_vm1, %v3292_v15 }
  0x62   : > { %2896 = vmatmul.mubr.msk.f32.gmra.mxu0 %vm491_vm1, %v3332_v25  ;;  %v4398_v25 = vld [vmem:[#allocation7_spill] sm:$0xff] }
  0x63   : > { %2898 = vmatprep.mubr.msk.f32.mxu0 %vm491_vm1, %v3338_v27 }
  0x64   : > { %2949 = vmatmul.mubr.msk.f32.gmra.mxu1 %vm491_vm1, %v3295_v16 }
  0x65   : > { %2951 = vmatprep.mubr.msk.f32.mxu1 %vm491_vm1, %v3309_v21 }
  0x66   : > { %2899 = vmatmul.mubr.msk.f32.gmra.mxu0 %vm491_vm1, %v3357_v32 }
  0x67   : > { %2901 = vmatprep.mubr.msk.f32.mxu0 %vm491_vm1, %v3362_v34 }
  0x68   : > { %2952 = vmatmul.mubr.msk.f32.gmra.mxu1 %vm491_vm1, %v3317_v23 }
  0x69   : > { %2954 = vmatprep.mubr.msk.f32.mxu1 %vm491_vm1, %v3347_v30 }
  0x6a   : > { %2902 = vmatmul.mubr.msk.f32.gmra.mxu0 %vm491_vm1, %v3379_v39 }
  0x6b   : > { %2904 = vmatprep.mubr.msk.f32.mxu0 %vm491_vm1, %v3385_v41 }
  0x6c   : > { %2955 = vmatmul.mubr.msk.f32.gmra.mxu1 %vm491_vm1, %v3350_v31 }
  0x6d   : > { %2957 = vmatprep.mubr.msk.f32.mxu1 %vm491_vm1, %v3367_v37 }
  0x6e   : > { %2905 = vmatmul.mubr.msk.f32.gmra.mxu0 %vm491_vm1, %v3402_v46 }
  0x6f   : > { %2907 = vmatprep.mubr.msk.f32.mxu0 %vm491_vm1, %v3407_v48 }
  0x70   : > { %2958 = vmatmul.mubr.msk.f32.gmra.mxu1 %vm491_vm1, %v3372_v38 }
  0x71   : > { %2960 = vmatprep.mubr.msk.f32.mxu1 %vm491_vm1, %v3392_v44 }
  0x72   : > { %2908 = vmatmul.mubr.msk.f32.gmra.mxu0 %vm491_vm1, %v3424_v53 }
  0x73   : > { %2910 = vmatprep.mubr.msk.f32.mxu0 %vm491_vm1, %v3430_v55 }
  0x74   : > { %2961 = vmatmul.mubr.msk.f32.gmra.mxu1 %vm491_vm1, %v3395_v45 }
  0x75   : > { %2963 = vmatprep.mubr.msk.f32.mxu1 %vm491_vm1, %v3412_v51 }
  0x76   : > { %2911 = vmatmul.mubr.msk.f32.gmra.mxu0 %vm491_vm1, %v3447_v60 }
  0x77   : > { %2913 = vmatprep.mubr.msk.f32.mxu0 %vm491_vm1, %v3452_v62 }
  0x78   : > { %2964 = vmatmul.mubr.msk.f32.gmra.mxu1 %vm491_vm1, %v3417_v52 }
  0x79   : > { %2966 = vmatprep.mubr.msk.f32.mxu1 %vm491_vm1, %v3437_v58 }
  0x7a   : > { %2914 = vmatmul.mubr.msk.f32.gmra.mxu0 %vm491_vm1, %v3469_v3 }
  0x7b   : > { %2916 = vmatprep.mubr.msk.f32.mxu0 %vm491_vm1, %v3475_v9 }
  0x7c   : > { %2967 = vmatmul.mubr.msk.f32.gmra.mxu1 %vm491_vm1, %v3440_v59 }
  0x7d   : > { %2969 = vmatprep.mubr.msk.f32.mxu1 %vm491_vm1, %v3457_v1 }
  0x7e   : > { %2917 = vmatmul.mubr.msk.f32.gmra.mxu0 %vm491_vm1, %v3492_v19 }
  0x7f   : > { %2919 = vmatprep.mubr.msk.f32.mxu0 %vm491_vm1, %v3497_v26 }
  0x80   : > { %2970 = vmatmul.mubr.msk.f32.gmra.mxu1 %vm491_vm1, %v3462_v2 }
  0x81   : > { %2972 = vmatprep.mubr.msk.f32.mxu1 %vm491_vm1, %v3482_v13 }
  0x82   : > { %2920 = vmatmul.mubr.msk.f32.gmra.mxu0 %vm491_vm1, %v3514_v36 }
  0x83   : > { %2922 = vmatprep.mubr.msk.f32.mxu0 %vm491_vm1, %v3520_v42 }
  0x84   : > { %2973 = vmatmul.mubr.msk.f32.gmra.mxu1 %vm491_vm1, %v3485_v14 }
  0x85   : > { %2975 = vmatprep.mubr.msk.f32.mxu1 %vm491_vm1, %v3502_v33 }
  0x86   : > { %2923 = vmatmul.mubr.msk.f32.gmra.mxu0 %vm491_vm1, %v3537_v54 }
  0x87   : > { %2925 = vmatprep.mubr.msk.f32.mxu0 %vm491_vm1, %v4389_v4 }
  0x88   : > { %2976 = vmatmul.mubr.msk.f32.gmra.mxu1 %vm491_vm1, %v4390_v5 }
  0x89   : > { %2978 = vmatprep.mubr.msk.f32.mxu1 %vm491_vm1, %v4391_v6 }
  0x8a   : > { %2926 = vmatmul.mubr.msk.f32.gmra.mxu0 %vm491_vm1, %v4392_v7 }
  0x8b   : > { %2928 = vmatprep.mubr.msk.f32.mxu0 %vm491_vm1, %v4393_v11 }
  0x8c   : > { %2979 = vmatmul.mubr.msk.f32.gmra.mxu1 %vm491_vm1, %v4394_v17 }
  0x8d   : > { %2981 = vmatprep.mubr.msk.f32.mxu1 %vm491_vm1, %v4395_v18 }
  0x8e   : > { %2929 = vmatmul.mubr.msk.f32.gmra.mxu0 %vm491_vm1, %v4396_v22 }
  0x8f   : > { %2931 = vmatprep.mubr.msk.f32.mxu0 %vm491_vm1, %v4397_v24 }
  0x90   : > { %2982 = vmatmul.mubr.msk.f32.gmra.mxu1 %vm491_vm1, %v4398_v25 }
  0x91   : > { %2984 = vmatprep.mubr.msk.f32.mxu1 %vm491_vm1, %v4399_v50 }
  0x92   : > { %2932 = vmatmul.mubr.msk.f32.gmra.mxu0 %vm491_vm1, %v4400_v57 }
  0x93   : > { %2934 = vmatprep.mubr.msk.f32.mxu0 %vm491_vm1, %v3613_v0 }
  0x94   : > { %2985 = vmatmul.mubr.msk.f32.gmra.mxu1 %vm491_vm1, %v3576_v43 }
  0x95   : > { %2987 = vmatprep.mubr.msk.f32.mxu1 %vm491_vm1, %v3593_v10 }
  0x96   : > { %2935 = vmatmul.mubr.msk.f32.gmra.mxu0 %vm491_vm1, %v3635_v20 }
  0x97   : > { %2937 = vmatprep.mubr.msk.f32.mxu0 %vm491_vm1, %v3641_v12 }
  0x98   : > { %2988 = vmatmul.mubr.msk.f32.gmra.mxu1 %vm491_vm1, %v3598_v63 }
  0x99   : > { %3042 = vmatprep.mubr.msk.f32.mxu1 %vm491_vm1, %v3338_v27 }
  0x9a   : > { %2938 = vmatmul.mubr.msk.f32.gmra.mxu0 %vm491_vm1, %v3659_v29 }
  0x9b   : > { %2992 = vmatprep.mubr.msk.f32.mxu0 %vm491_vm1, %v3292_v15  ;;  %v4401_v15 = vld [vmem:[#allocation14_spill] sm:$0xff] }
  0x9c   : > { %3043 = vmatmul.mubr.msk.f32.vlgmr.msra.gmra.mxu1 %vm491_vm1, %v3357_v32  ;;  %v3935_v32 = vld [vmem:[%s4344_s3] ss:$0 sm:$0xff] }
  0x9d   : > { %3045 = vmatprep.mubr.msk.f32.mxu1 %vm491_vm1, %v3362_v34 }
  0x9e   : > { %2993 = vmatmul.mubr.msk.f32.vlgmr.msra.gmra.mxu0 %vm491_vm1, %v3295_v16  ;;  %v4402_v16 = vld [vmem:[#allocation17_spill] sm:$0xff] }
  0x9f   : > { %2995 = vmatprep.mubr.msk.f32.mxu0 %vm491_vm1, %v3309_v21  ;;  %v4403_v21 = vld [vmem:[#allocation15_spill] sm:$0xff] }
  0xa0   : > { %3046 = vmatmul.mubr.msk.f32.gmra.mxu1 %vm491_vm1, %v3379_v39 }
  0xa1   : > { %3048 = vmatprep.mubr.msk.f32.mxu1 %vm491_vm1, %v3385_v41 }
  0xa2   : > { %2996 = vmatmul.mubr.msk.f32.gmra.mxu0 %vm491_vm1, %v3317_v23  ;;  %v4404_v23 = vld [vmem:[#allocation16_spill] sm:$0xff] }
  0xa3   : > { %2998 = vmatprep.mubr.msk.f32.mxu0 %vm491_vm1, %v3347_v30 }
  0xa4   : > { %3049 = vmatmul.mubr.msk.f32.gmra.mxu1 %vm491_vm1, %v3402_v46 }
  0xa5   : > { %3051 = vmatprep.mubr.msk.f32.mxu1 %vm491_vm1, %v3407_v48 }
  0xa6   : > { %2999 = vmatmul.mubr.msk.f32.gmra.mxu0 %vm491_vm1, %v3350_v31 }
  0xa7   : > { %3001 = vmatprep.mubr.msk.f32.mxu0 %vm491_vm1, %v3367_v37 }
  0xa8   : > { %3052 = vmatmul.mubr.msk.f32.gmra.mxu1 %vm491_vm1, %v3424_v53 }
  0xa9   : > { %3054 = vmatprep.mubr.msk.f32.mxu1 %vm491_vm1, %v3430_v55 }
  0xaa   : > { %3002 = vmatmul.mubr.msk.f32.gmra.mxu0 %vm491_vm1, %v3372_v38 }
  0xab   : > { %3004 = vmatprep.mubr.msk.f32.mxu0 %vm491_vm1, %v3392_v44 }
  0xac   : > { %3055 = vmatmul.mubr.msk.f32.gmra.mxu1 %vm491_vm1, %v3447_v60 }
  0xad   : > { %3057 = vmatprep.mubr.msk.f32.mxu1 %vm491_vm1, %v3452_v62 }
  0xae   : > { %3005 = vmatmul.mubr.msk.f32.gmra.mxu0 %vm491_vm1, %v3395_v45 }
  0xaf   : > { %3007 = vmatprep.mubr.msk.f32.mxu0 %vm491_vm1, %v3412_v51 }
  0xb0   : > { %3058 = vmatmul.mubr.msk.f32.gmra.mxu1 %vm491_vm1, %v3469_v3 }
  0xb1   : > { %3060 = vmatprep.mubr.msk.f32.mxu1 %vm491_vm1, %v3475_v9 }
  0xb2   : > { %3008 = vmatmul.mubr.msk.f32.gmra.mxu0 %vm491_vm1, %v3417_v52 }
  0xb3   : > { %3010 = vmatprep.mubr.msk.f32.mxu0 %vm491_vm1, %v3437_v58 }
  0xb4   : > { %3061 = vmatmul.mubr.msk.f32.gmra.mxu1 %vm491_vm1, %v3492_v19 }
  0xb5   : > { %3063 = vmatprep.mubr.msk.f32.mxu1 %vm491_vm1, %v3497_v26 }
  0xb6   : > { %3011 = vmatmul.mubr.msk.f32.gmra.mxu0 %vm491_vm1, %v3440_v59 }
  0xb7   : > { %3013 = vmatprep.mubr.msk.f32.mxu0 %vm491_vm1, %v3457_v1 }
  0xb8   : > { %3064 = vmatmul.mubr.msk.f32.gmra.mxu1 %vm491_vm1, %v3514_v36 }
  0xb9   : > { %3066 = vmatprep.mubr.msk.f32.mxu1 %vm491_vm1, %v3520_v42 }
  0xba   : > { %3014 = vmatmul.mubr.msk.f32.gmra.mxu0 %vm491_vm1, %v3462_v2 }
  0xbb   : > { %3016 = vmatprep.mubr.msk.f32.mxu0 %vm491_vm1, %v3482_v13 }
  0xbc   : > { %3067 = vmatmul.mubr.msk.f32.gmra.mxu1 %vm491_vm1, %v3537_v54 }
  0xbd   : > { %3069 = vmatprep.mubr.msk.f32.mxu1 %vm491_vm1, %v4389_v4 }
  0xbe   : > { %3017 = vmatmul.mubr.msk.f32.gmra.mxu0 %vm491_vm1, %v3485_v14 }
  0xbf   : > { %3019 = vmatprep.mubr.msk.f32.mxu0 %vm491_vm1, %v3502_v33 }
  0xc0   : > { %3070 = vmatmul.mubr.msk.f32.gmra.mxu1 %vm491_vm1, %v4392_v7 }
  0xc1   : > { %3072 = vmatprep.mubr.msk.f32.mxu1 %vm491_vm1, %v4393_v11 }
  0xc2   : > { %3020 = vmatmul.mubr.msk.f32.gmra.mxu0 %vm491_vm1, %v4390_v5 }
  0xc3   : > { %3022 = vmatprep.mubr.msk.f32.mxu0 %vm491_vm1, %v4391_v6 }
  0xc4   : > { %3073 = vmatmul.mubr.msk.f32.gmra.mxu1 %vm491_vm1, %v4396_v22 }
  0xc5   : > { %3075 = vmatprep.mubr.msk.f32.mxu1 %vm491_vm1, %v4397_v24 }
  0xc6   : > { %3023 = vmatmul.mubr.msk.f32.gmra.mxu0 %vm491_vm1, %v4394_v17 }
  0xc7   : > { %3025 = vmatprep.mubr.msk.f32.mxu0 %vm491_vm1, %v4395_v18 }
  0xc8   : > { %3076 = vmatmul.mubr.msk.f32.gmra.mxu1 %vm491_vm1, %v4400_v57 }
  0xc9   : > { %3078 = vmatprep.mubr.msk.f32.mxu1 %vm491_vm1, %v3613_v0 }
  0xca   : > { %3026 = vmatmul.mubr.msk.f32.gmra.mxu0 %vm491_vm1, %v4398_v25 }
  0xcb   : > { %3028 = vmatprep.mubr.msk.f32.mxu0 %vm491_vm1, %v4399_v50 }
  0xcc   : > { %3079 = vmatmul.mubr.msk.f32.gmra.mxu1 %vm491_vm1, %v3635_v20 }
  0xcd   : > { %3081 = vmatprep.mubr.msk.f32.mxu1 %vm491_vm1, %v3641_v12 }
  0xce   : > { %3029 = vmatmul.mubr.msk.f32.gmra.mxu0 %vm491_vm1, %v3576_v43 }
  0xcf   : > { %3031 = vmatprep.mubr.msk.f32.mxu0 %vm491_vm1, %v3593_v10 }
  0xd0   : > { %3082 = vmatmul.mubr.msk.f32.gmra.mxu1 %vm491_vm1, %v3659_v29 }
  0xd1   : > { %3084 = vmatprep.mubr.msk.f32.mxu1 %vm491_vm1, %v3644_v28 }
  0xd2   : > { %3032 = vmatmul.mubr.msk.f32.gmra.mxu0 %vm491_vm1, %v3598_v63 }
  0xd3   : > { %3034 = vmatprep.mubr.msk.f32.mxu0 %vm491_vm1, %v4401_v15 }
  0xd4   : > { %3085 = vmatmul.mubr.msk.f32.gmra.mxu1 %vm491_vm1, %v4402_v16 }
  0xd5   : > { %3087 = vmatprep.mubr.msk.f32.mxu1 %vm491_vm1, %v3664_v8 }
  0xd6   : > { %3035 = vmatmul.mubr.msk.f32.gmra.mxu0 %vm491_vm1, %v4403_v21 }
  0xd7   : > { %3037 = vmatprep.mubr.msk.f32.mxu0 %vm491_vm1, %v4404_v23 }
  0xd8   : > { %3088 = vmatmul.mubr.msk.f32.gmra.mxu1 %vm491_vm1, %v3669_v56 }
  0xda   : > { %3038 = vmatmul.mubr.msk.f32.gmra.mxu0 %vm491_vm1, %v3651_v35 }
  0xdb   : > { %v2844_v27 = vpop.f32.mrf.mxu1 }
  0xdd   : > { %v918_v30 = vpop.f32.mrf.mxu1 }
  0xde   : > { %v2794_v31 = vpop.f32.mrf.mxu0 }
  0xdf   : > { %v924_v34 = vadd.f32 %v2844_v27, %v2794_v31 }
  0xe0   : > { %v626_v37 = vpop.f32.mrf.mxu0  ;;  %v2847_v38 = vpop.f32.mrf.mxu1 }
  0xe1   : > { %v1084_v39 = vadd.f32 %v3935_v32, %v924_v34  ;;  %v919_v41 = vadd.f32 %v918_v30, %v626_v37 }
  0xe2   : > { %v2797_v44 = vpop.f32.mrf.mxu0  ;;  %v928_v45 = vpop.f32.mrf.mxu1 }
  0xe3   : > { %2149 = vst.msk [vmem:[%s3940_s12 + $0x8] sm:$0xff] %vm2147_vm3, %v1084_v39  ;;  %v1083_v46 = vadd.f32 %v3935_v32, %v919_v41  ;;  %v934_v48 = vadd.f32 %v2847_v38, %v2797_v44 }
  0xe4   : > { %v636_v51 = vpop.f32.mrf.mxu0  ;;  %v2850_v52 = vpop.f32.mrf.mxu1 }
  0xe5   : > { %2148 = vst.msk [vmem:[%s3940_s12] sm:$0xff] %vm2147_vm3, %v1083_v46  ;;  %v1086_v53 = vadd.f32 %v3935_v32, %v934_v48  ;;  %v929_v55 = vadd.f32 %v928_v45, %v636_v51 }
  0xe6   : > { %v2800_v58 = vpop.f32.mrf.mxu0  ;;  %v938_v59 = vpop.f32.mrf.mxu1 }
  0xe7   : > { %2151 = vst.msk [vmem:[%s3940_s12 + $0x18] sm:$0xff] %vm2147_vm3, %v1086_v53  ;;  %v1085_v60 = vadd.f32 %v3935_v32, %v929_v55  ;;  %v944_v62 = vadd.f32 %v2850_v52, %v2800_v58 }
  0xe8   : > { %v646_v1 = vpop.f32.mrf.mxu0  ;;  %v2853_v2 = vpop.f32.mrf.mxu1 }
  0xe9   : > { %2150 = vst.msk [vmem:[%s3940_s12 + $0x10] sm:$0xff] %vm2147_vm3, %v1085_v60  ;;  %v1088_v3 = vadd.f32 %v3935_v32, %v944_v62  ;;  %v939_v9 = vadd.f32 %v938_v59, %v646_v1 }
  0xea   : > { %v2803_v13 = vpop.f32.mrf.mxu0  ;;  %v948_v14 = vpop.f32.mrf.mxu1 }
  0xeb   : > { %2153 = vst.msk [vmem:[%s3940_s12 + $0x48] sm:$0xff] %vm2147_vm3, %v1088_v3  ;;  %v1087_v19 = vadd.f32 %v3935_v32, %v939_v9  ;;  %v954_v26 = vadd.f32 %v2853_v2, %v2803_v13 }
  0xec   : > { %v656_v33 = vpop.f32.mrf.mxu0  ;;  %v2856_v36 = vpop.f32.mrf.mxu1 }
  0xed   : > { %2152 = vst.msk [vmem:[%s3940_s12 + $0x40] sm:$0xff] %vm2147_vm3, %v1087_v19  ;;  %v1090_v42 = vadd.f32 %v3935_v32, %v954_v26  ;;  %v949_v54 = vadd.f32 %v948_v14, %v656_v33 }
  0xee   : > { %v2806_v0 = vpop.f32.mrf.mxu0  ;;  %v958_v10 = vpop.f32.mrf.mxu1 }
  0xef   : > { %2155 = vst.msk [vmem:[%s3940_s12 + $0x58] sm:$0xff] %vm2147_vm3, %v1090_v42  ;;  %v1089_v20 = vadd.f32 %v3935_v32, %v949_v54  ;;  %v964_v40 = vadd.f32 %v2856_v36, %v2806_v0 }
  0xf0   : > { %v666_v43 = vpop.f32.mrf.mxu0  ;;  %v2859_v61 = vpop.f32.mrf.mxu1 }
  0xf1   : > { %2154 = vst.msk [vmem:[%s3940_s12 + $0x50] sm:$0xff] %vm2147_vm3, %v1089_v20  ;;  %v1092_v63 = vadd.f32 %v3935_v32, %v964_v40  ;;  %v959_v12 = vadd.f32 %v958_v10, %v666_v43 }
  0xf2   : > { %v2809_v28 = vpop.f32.mrf.mxu0  ;;  %v968_v56 = vpop.f32.mrf.mxu1 }
  0xf3   : > { %2157 = vst.msk [vmem:[%s3940_s12 + $0x88] sm:$0xff] %vm2147_vm3, %v1092_v63  ;;  %v1091_v35 = vadd.f32 %v3935_v32, %v959_v12  ;;  %v974_v47 = vadd.f32 %v2859_v61, %v2809_v28 }
  0xf4   : > { %v676_v29 = vpop.f32.mrf.mxu0  ;;  %v2862_v49 = vpop.f32.mrf.mxu1 }
  0xf5   : > { %2156 = vst.msk [vmem:[%s3940_s12 + $0x80] sm:$0xff] %vm2147_vm3, %v1091_v35  ;;  %v1094_v8 = vadd.f32 %v3935_v32, %v974_v47  ;;  %v969_v4 = vadd.f32 %v968_v56, %v676_v29 }
  0xf6   : > { %v2812_v5 = vpop.f32.mrf.mxu0  ;;  %v978_v6 = vpop.f32.mrf.mxu1 }
  0xf7   : > { %2159 = vst.msk [vmem:[%s3940_s12 + $0x98] sm:$0xff] %vm2147_vm3, %v1094_v8  ;;  %v1093_v7 = vadd.f32 %v3935_v32, %v969_v4  ;;  %v984_v11 = vadd.f32 %v2862_v49, %v2812_v5 }
  0xf8   : > { %v686_v17 = vpop.f32.mrf.mxu0  ;;  %v2865_v18 = vpop.f32.mrf.mxu1 }
  0xf9   : > { %2158 = vst.msk [vmem:[%s3940_s12 + $0x90] sm:$0xff] %vm2147_vm3, %v1093_v7  ;;  %v1096_v22 = vadd.f32 %v3935_v32, %v984_v11  ;;  %v979_v24 = vadd.f32 %v978_v6, %v686_v17 }
  0xfa   : > { %v2815_v25 = vpop.f32.mrf.mxu0  ;;  %v988_v50 = vpop.f32.mrf.mxu1 }
  0xfb   : > { %2161 = vst.msk [vmem:[%s3940_s12 + $0xc8] sm:$0xff] %vm2147_vm3, %v1096_v22  ;;  %v1095_v57 = vadd.f32 %v3935_v32, %v979_v24  ;;  %v994_v15 = vadd.f32 %v2865_v18, %v2815_v25 }
  0xfc   : > { %v696_v16 = vpop.f32.mrf.mxu0  ;;  %v2868_v21 = vpop.f32.mrf.mxu1 }
  0xfd   : > { %2160 = vst.msk [vmem:[%s3940_s12 + $0xc0] sm:$0xff] %vm2147_vm3, %v1095_v57  ;;  %v1098_v23 = vadd.f32 %v3935_v32, %v994_v15  ;;  %v989_v27 = vadd.f32 %v988_v50, %v696_v16 }
  0xfe   : > { %v2818_v30 = vpop.f32.mrf.mxu0  ;;  %v998_v31 = vpop.f32.mrf.mxu1 }
  0xff   : > { %2163 = vst.msk [vmem:[%s3940_s12 + $0xd8] sm:$0xff] %vm2147_vm3, %v1098_v23  ;;  %v1097_v34 = vadd.f32 %v3935_v32, %v989_v27  ;;  %v1004_v37 = vadd.f32 %v2868_v21, %v2818_v30 }
 0x100   : > { %v706_v38 = vpop.f32.mrf.mxu0  ;;  %v2871_v39 = vpop.f32.mrf.mxu1 }
 0x101   : > { %2162 = vst.msk [vmem:[%s3940_s12 + $0xd0] sm:$0xff] %vm2147_vm3, %v1097_v34  ;;  %v1100_v41 = vadd.f32 %v3935_v32, %v1004_v37  ;;  %v999_v44 = vadd.f32 %v998_v31, %v706_v38 }
 0x102   : > { %v2821_v45 = vpop.f32.mrf.mxu0  ;;  %v1008_v46 = vpop.f32.mrf.mxu1 }
 0x103   : > { %2165 = vst.msk [vmem:[%s3940_s12 + $0x108] sm:$0xff] %vm2147_vm3, %v1100_v41  ;;  %v1099_v48 = vadd.f32 %v3935_v32, %v999_v44  ;;  %v1014_v51 = vadd.f32 %v2871_v39, %v2821_v45 }
 0x104   : > { %v716_v52 = vpop.f32.mrf.mxu0  ;;  %v2874_v53 = vpop.f32.mrf.mxu1 }
 0x105   : > { %2164 = vst.msk [vmem:[%s3940_s12 + $0x100] sm:$0xff] %vm2147_vm3, %v1099_v48  ;;  %v1102_v55 = vadd.f32 %v3935_v32, %v1014_v51  ;;  %v1009_v58 = vadd.f32 %v1008_v46, %v716_v52 }
 0x106   : > { %v2824_v59 = vpop.f32.mrf.mxu0  ;;  %v1018_v60 = vpop.f32.mrf.mxu1 }
 0x107   : > { %2167 = vst.msk [vmem:[%s3940_s12 + $0x118] sm:$0xff] %vm2147_vm3, %v1102_v55  ;;  %v1101_v62 = vadd.f32 %v3935_v32, %v1009_v58  ;;  %v1024_v1 = vadd.f32 %v2874_v53, %v2824_v59 }
 0x108   : > { %v726_v2 = vpop.f32.mrf.mxu0  ;;  %v2877_v3 = vpop.f32.mrf.mxu1 }
 0x109   : > { %2166 = vst.msk [vmem:[%s3940_s12 + $0x110] sm:$0xff] %vm2147_vm3, %v1101_v62  ;;  %v1104_v9 = vadd.f32 %v3935_v32, %v1024_v1  ;;  %v1019_v13 = vadd.f32 %v1018_v60, %v726_v2 }
 0x10a   : > { %v2827_v14 = vpop.f32.mrf.mxu0  ;;  %v1028_v19 = vpop.f32.mrf.mxu1 }
 0x10b   : > { %2169 = vst.msk [vmem:[%s3940_s12 + $0x148] sm:$0xff] %vm2147_vm3, %v1104_v9  ;;  %v1103_v26 = vadd.f32 %v3935_v32, %v1019_v13  ;;  %v1034_v33 = vadd.f32 %v2877_v3, %v2827_v14 }
 0x10c   : > { %v736_v36 = vpop.f32.mrf.mxu0  ;;  %v2880_v42 = vpop.f32.mrf.mxu1 }
 0x10d   : > { %2168 = vst.msk [vmem:[%s3940_s12 + $0x140] sm:$0xff] %vm2147_vm3, %v1103_v26  ;;  %v1106_v54 = vadd.f32 %v3935_v32, %v1034_v33  ;;  %v1029_v0 = vadd.f32 %v1028_v19, %v736_v36 }
 0x10e   : > { %v2830_v10 = vpop.f32.mrf.mxu0  ;;  %v1038_v20 = vpop.f32.mrf.mxu1 }
 0x10f   : > { %2171 = vst.msk [vmem:[%s3940_s12 + $0x158] sm:$0xff] %vm2147_vm3, %v1106_v54  ;;  %v1105_v40 = vadd.f32 %v3935_v32, %v1029_v0  ;;  %v1044_v43 = vadd.f32 %v2880_v42, %v2830_v10 }
 0x110   : > { %v746_v61 = vpop.f32.mrf.mxu0  ;;  %v2883_v63 = vpop.f32.mrf.mxu1 }
 0x111   : > { %2170 = vst.msk [vmem:[%s3940_s12 + $0x150] sm:$0xff] %vm2147_vm3, %v1105_v40  ;;  %v1108_v12 = vadd.f32 %v3935_v32, %v1044_v43  ;;  %v1039_v28 = vadd.f32 %v1038_v20, %v746_v61 }
 0x112   : > { %v2833_v56 = vpop.f32.mrf.mxu0  ;;  %v1048_v35 = vpop.f32.mrf.mxu1 }
 0x113   : > { %2173 = vst.msk [vmem:[%s3940_s12 + $0x188] sm:$0xff] %vm2147_vm3, %v1108_v12  ;;  %v1107_v47 = vadd.f32 %v3935_v32, %v1039_v28  ;;  %v1054_v29 = vadd.f32 %v2883_v63, %v2833_v56 }
 0x114   : > { %v756_v49 = vpop.f32.mrf.mxu0  ;;  %v2886_v8 = vpop.f32.mrf.mxu1 }
 0x115   : > { %2172 = vst.msk [vmem:[%s3940_s12 + $0x180] sm:$0xff] %vm2147_vm3, %v1107_v47  ;;  %v1110_v4 = vadd.f32 %v3935_v32, %v1054_v29  ;;  %v1049_v5 = vadd.f32 %v1048_v35, %v756_v49 }
 0x116   : > { %v2836_v6 = vpop.f32.mrf.mxu0  ;;  %v1058_v7 = vpop.f32.mrf.mxu1 }
 0x117   : > { %2175 = vst.msk [vmem:[%s3940_s12 + $0x198] sm:$0xff] %vm2147_vm3, %v1110_v4  ;;  %v1109_v11 = vadd.f32 %v3935_v32, %v1049_v5  ;;  %v1064_v17 = vadd.f32 %v2886_v8, %v2836_v6 }
 0x118   : > { %v766_v18 = vpop.f32.mrf.mxu0  ;;  %v2889_v22 = vpop.f32.mrf.mxu1 }
 0x119   : > { %2174 = vst.msk [vmem:[%s3940_s12 + $0x190] sm:$0xff] %vm2147_vm3, %v1109_v11  ;;  %v1112_v24 = vadd.f32 %v3935_v32, %v1064_v17  ;;  %v1059_v25 = vadd.f32 %v1058_v7, %v766_v18 }
 0x11a   : > { %v2839_v50 = vpop.f32.mrf.mxu0  ;;  %v1068_v57 = vpop.f32.mrf.mxu1 }
 0x11b   : > { %2177 = vst.msk [vmem:[%s3940_s12 + $0x1c8] sm:$0xff] %vm2147_vm3, %v1112_v24  ;;  %v1111_v15 = vadd.f32 %v3935_v32, %v1059_v25  ;;  %v1074_v16 = vadd.f32 %v2889_v22, %v2839_v50 }
 0x11c   : > { %v776_v21 = vpop.f32.mrf.mxu0  ;;  %v4030_v23 = vpop.f32.mrf.mxu1 }
 0x11d   : > { %2176 = vst.msk [vmem:[%s3940_s12 + $0x1c0] sm:$0xff] %vm2147_vm3, %v1111_v15  ;;  %v1114_v27 = vadd.f32 %v3935_v32, %v1074_v16  ;;  %v1069_v30 = vadd.f32 %v1068_v57, %v776_v21 }
 0x11e   : > { %v4035_v31 = vpop.f32.mrf.mxu0  ;;  %v4037_v34 = vpop.f32.mrf.mxu1 }
 0x11f   : > { %2179 = vst.msk [vmem:[%s3940_s12 + $0x1d8] sm:$0xff] %vm2147_vm3, %v1114_v27  ;;  %v1113_v37 = vadd.f32 %v3935_v32, %v1069_v30 }
 0x120   : > { %v4042_v38 = vpop.f32.mrf.mxu0  ;;  %v4044_v39 = vpop.f32.mrf.mxu1 }
 0x121   : > { %2178 = vst.msk [vmem:[%s3940_s12 + $0x1d0] sm:$0xff] %vm2147_vm3, %v1113_v37 }
 0x122   : > { %v4048_v41 = vpop.f32.mrf.mxu0  ;;  %v4050_v44 = vpop.f32.mrf.mxu1 }
 0x124   : > { %v4052_v45 = vpop.f32.mrf.mxu0  ;;  %v4054_v46 = vpop.f32.mrf.mxu1 }
 0x126   : > { %v4056_v48 = vpop.f32.mrf.mxu0  ;;  %v4058_v51 = vpop.f32.mrf.mxu1 }
 0x128   : > { %v4060_v52 = vpop.f32.mrf.mxu0  ;;  %v4062_v53 = vpop.f32.mrf.mxu1 }
 0x12a   : > { %v4064_v55 = vpop.f32.mrf.mxu0  ;;  %v4066_v58 = vpop.f32.mrf.mxu1 }
 0x12c   : > { %v4068_v59 = vpop.f32.mrf.mxu0  ;;  %v4070_v60 = vpop.f32.mrf.mxu1 }
 0x12e   : > { %v4072_v62 = vpop.f32.mrf.mxu0  ;;  %v4074_v1 = vpop.f32.mrf.mxu1 }
 0x130   : > { %v4076_v2 = vpop.f32.mrf.mxu0  ;;  %v4078_v3 = vpop.f32.mrf.mxu1 }
 0x132   : > { %v4080_v9 = vpop.f32.mrf.mxu0  ;;  %v4082_v13 = vpop.f32.mrf.mxu1 }
 0x134   : > { %v4084_v14 = vpop.f32.mrf.mxu0  ;;  %v4086_v19 = vpop.f32.mrf.mxu1 }
 0x136   : > { %v4088_v26 = vpop.f32.mrf.mxu0  ;;  %v4090_v33 = vpop.f32.mrf.mxu1 }
 0x138   : > { %v4092_v36 = vpop.f32.mrf.mxu0  ;;  %v4094_v42 = vpop.f32.mrf.mxu1 }
 0x13a   : > { %v4096_v54 = vpop.f32.mrf.mxu0  ;;  %v4098_v0 = vpop.f32.mrf.mxu1 }
 0x13c   : > { %v4100_v10 = vpop.f32.mrf.mxu0  ;;  %v4102_v20 = vpop.f32.mrf.mxu1 }
 0x13e   : > { %v4104_v40 = vpop.f32.mrf.mxu0  ;;  %v4106_v43 = vpop.f32.mrf.mxu1 }
 0x140   : > { %v4108_v61 = vpop.f32.mrf.mxu0  ;;  %v4110_v63 = vpop.f32.mrf.mxu1 }
 0x142   : > { %v4112_v12 = vpop.f32.mrf.mxu0  ;;  %v4114_v28 = vpop.f32.mrf.mxu1 }
 0x144   : > { %v4116_v56 = vpop.f32.mrf.mxu0  ;;  %v4118_v35 = vpop.f32.mrf.mxu1 }
 0x146   : > { %v4120_v47 = vpop.f32.mrf.mxu0  ;;  %v4122_v29 = vpop.f32.mrf.mxu1 }
 0x148   : > { %v4124_v49 = vpop.f32.mrf.mxu0  ;;  %v4126_v8 = vpop.f32.mrf.mxu1 }
 0x14a   : > { %v4128_v4 = vpop.f32.mrf.mxu0  ;;  %v4130_v5 = vpop.f32.mrf.mxu1 }
 0x14c   : > { %v4132_v6 = vpop.f32.mrf.mxu0  ;;  %v4134_v7 = vpop.f32.mrf.mxu1 }
 0x14d   : > { %4405 = vst [vmem:[#allocation5_spill] sm:$0xff] %v4134_v7 }
 0x14e   : > { %v4136_v11 = vpop.f32.mrf.mxu0  ;;  %v4138_v17 = vpop.f32.mrf.mxu1 }
 0x14f   : > { %4406 = vst [vmem:[#allocation2_spill] sm:$0xff] %v4136_v11  ;;  %4407 = vst [vmem:[#allocation3_spill] sm:$0xff] %v4138_v17 }
 0x150   : > { %v4140_v18 = vpop.f32.mrf.mxu0  ;;  %v4142_v22 = vpop.f32.mrf.mxu1 }
 0x151   : > { %4408 = vst [vmem:[#allocation8_spill] sm:$0xff] %v4140_v18  ;;  %4409 = vst [vmem:[#allocation9_spill] sm:$0xff] %v4142_v22 }
 0x152   : > { %v4144_v24 = vpop.f32.mrf.mxu0  ;;  %v4146_v25 = vpop.f32.mrf.mxu1 }
 0x153   : > { %4410 = vst [vmem:[#allocation4_spill] sm:$0xff] %v4144_v24  ;;  %4411 = vst [vmem:[#allocation6_spill] sm:$0xff] %v4146_v25  ;;  %v1422_v25 = vadd.f32 %v4030_v23, %v4035_v31  ;;  %v1427_v23 = vadd.f32 %v4050_v44, %v4052_v45  ;;  %v1437_v44 = vadd.f32 %v4058_v51, %v4060_v52 }
 0x154   : > { %v4148_v50 = vpop.f32.mrf.mxu0  ;;  %v4150_v57 = vpop.f32.mrf.mxu1  ;;  %v1447_v52 = vadd.f32 %v4066_v58, %v4068_v59  ;;  %v1457_v59 = vadd.f32 %v4074_v1, %v4076_v2  ;;  %v1467_v2 = vadd.f32 %v4082_v13, %v4084_v14  ;;  %v1477_v14 = vadd.f32 %v4090_v33, %v4092_v36 }
 0x155   : > { %4412 = vst [vmem:[#allocation11_spill] sm:$0xff] %v4148_v50  ;;  %4413 = vst [vmem:[#allocation12_spill] sm:$0xff] %v4150_v57  ;;  %v1487_v36 = vadd.f32 %v4098_v0, %v4100_v10  ;;  %v1497_v10 = vadd.f32 %v4106_v43, %v4108_v61  ;;  %v1507_v61 = vadd.f32 %v4114_v28, %v4116_v56 }
 0x156   : > { %v4152_v15 = vpop.f32.mrf.mxu0  ;;  %v4154_v16 = vpop.f32.mrf.mxu1  ;;  %v1517_v56 = vadd.f32 %v4122_v29, %v4124_v49  ;;  %v1527_v49 = vadd.f32 %v4130_v5, %v4132_v6 }
 0x157   : > { %4414 = vst [vmem:[#allocation7_spill] sm:$0xff] %v4152_v15  ;;  %4415 = vst [vmem:[#allocation10_spill] sm:$0xff] %v4154_v16  ;;  %v1417_v15 = vadd.f32 %v4037_v34, %v4042_v38 }
 0x158   : > { %v4156_v21 = vpop.f32.mrf.mxu0  ;;  %v4158_v27 = vpop.f32.mrf.mxu1  ;;  %v4423_v6 = vld [vmem:[#allocation8_spill] sm:$0xff] }
 0x159   : > { %4416 = vst [vmem:[#allocation13_spill] sm:$0xff] %v4156_v21  ;;  %4417 = vst [vmem:[#allocation14_spill] sm:$0xff] %v4158_v27  ;;  %v1432_v27 = vadd.f32 %v4044_v39, %v4048_v41 }
 0x15a   : > { %v4160_v30 = vpop.f32.mrf.mxu0  ;;  %v4162_v37 = vpop.f32.mrf.mxu1 }
 0x15b   : > { %4418 = vst [vmem:[#allocation17_spill] sm:$0xff] %v4160_v30  ;;  %4419 = vst [vmem:[#allocation15_spill] sm:$0xff] %v4162_v37 }
 0x15c   : > { %v4164_v22 = vpop.f32.mrf.mxu0  ;;  %v3044_v24 = vpop.f32.mrf.mxu1 }
 0x15d   : > { %4420 = vst [vmem:[#allocation16_spill] sm:$0xff] %v4164_v22 }
 0x15e   : > { %v2994_v50 = vpop.f32.mrf.mxu0  ;;  %v1924_v57 = vpop.f32.mrf.mxu1 }
 0x15f   : > { %v1814_v16 = vadd.f32 %v2994_v50, %v1422_v25  ;;  %v1442_v25 = vadd.f32 %v4054_v46, %v4056_v48  ;;  %v1452_v48 = vadd.f32 %v4062_v53, %v4064_v55  ;;  %v1462_v55 = vadd.f32 %v4070_v60, %v4072_v62 }
 0x160   : > { %v1654_v21 = vpop.f32.mrf.mxu0  ;;  %v3047_v17 = vpop.f32.mrf.mxu1  ;;  %v1472_v62 = vadd.f32 %v4078_v3, %v4080_v9  ;;  %v1482_v9 = vadd.f32 %v4086_v19, %v4088_v26  ;;  %v1492_v26 = vadd.f32 %v4094_v42, %v4096_v54  ;;  %v1502_v54 = vadd.f32 %v4102_v20, %v4104_v40 }
 0x161   : > { %v2084_v30 = vadd.f32 %v3044_v24, %v1814_v16  ;;  %v1813_v37 = vadd.f32 %v1654_v21, %v1417_v15  ;;  %v1512_v40 = vadd.f32 %v4110_v63, %v4112_v12  ;;  %v1522_v12 = vadd.f32 %v4118_v35, %v4120_v47 }
 0x162   : > { %v2997_v18 = vpop.f32.mrf.mxu0  ;;  %v1934_v22 = vpop.f32.mrf.mxu1  ;;  %v1532_v47 = vadd.f32 %v4126_v8, %v4128_v4  ;;  %v4421_v4 = vld [vmem:[#allocation2_spill] sm:$0xff] }
 0x163   : > { %v2116_v31 = vadd.f32 %v3935_v32, %v2084_v30  ;;  %v2083_v7 = vadd.f32 %v1924_v57, %v1813_v37  ;;  %v1816_v11 = vadd.f32 %v2997_v18, %v1432_v27 }
 0x164   : > { %v1664_v34 = vpop.f32.mrf.mxu0  ;;  %v3050_v38 = vpop.f32.mrf.mxu1 }
 0x165   : > { %2553 = vst.msk [vmem:[%s3940_s12 + $0x28] sm:$0xff] %vm2147_vm3, %v2116_v31  ;;  %v2115_v39 = vadd.f32 %v3935_v32, %v2083_v7  ;;  %v2086_v41 = vadd.f32 %v3047_v17, %v1816_v11  ;;  %v1815_v24 = vadd.f32 %v1664_v34, %v1427_v23 }
 0x166   : > { %v3000_v50 = vpop.f32.mrf.mxu0  ;;  %v1944_v15 = vpop.f32.mrf.mxu1 }
 0x167   : > { %2552 = vst.msk [vmem:[%s3940_s12 + $0x20] sm:$0xff] %vm2147_vm3, %v2115_v39  ;;  %v2118_v45 = vadd.f32 %v3935_v32, %v2086_v41  ;;  %v2085_v18 = vadd.f32 %v1934_v22, %v1815_v24  ;;  %v1818_v57 = vadd.f32 %v3000_v50, %v1442_v25 }
 0x168   : > { %v1674_v16 = vpop.f32.mrf.mxu0  ;;  %v3053_v46 = vpop.f32.mrf.mxu1 }
 0x169   : > { %2555 = vst.msk [vmem:[%s3940_s12 + $0x38] sm:$0xff] %vm2147_vm3, %v2118_v45  ;;  %v2117_v7 = vadd.f32 %v3935_v32, %v2085_v18  ;;  %v2088_v11 = vadd.f32 %v3050_v38, %v1818_v57  ;;  %v1817_v17 = vadd.f32 %v1674_v16, %v1437_v44 }
 0x16a   : > { %v3003_v21 = vpop.f32.mrf.mxu0  ;;  %v1954_v51 = vpop.f32.mrf.mxu1 }
 0x16b   : > { %2554 = vst.msk [vmem:[%s3940_s12 + $0x30] sm:$0xff] %vm2147_vm3, %v2117_v7  ;;  %v2120_v22 = vadd.f32 %v3935_v32, %v2088_v11  ;;  %v2087_v27 = vadd.f32 %v1944_v15, %v1817_v17  ;;  %v1820_v30 = vadd.f32 %v3003_v21, %v1452_v48 }
 0x16c   : > { %v1684_v37 = vpop.f32.mrf.mxu0  ;;  %v3056_v53 = vpop.f32.mrf.mxu1 }
 0x16d   : > { %2557 = vst.msk [vmem:[%s3940_s12 + $0x68] sm:$0xff] %vm2147_vm3, %v2120_v22  ;;  %v2119_v23 = vadd.f32 %v3935_v32, %v2087_v27  ;;  %v2090_v31 = vadd.f32 %v3053_v46, %v1820_v30  ;;  %v1819_v34 = vadd.f32 %v1684_v37, %v1447_v52 }
 0x16e   : > { %v3006_v38 = vpop.f32.mrf.mxu0  ;;  %v1964_v58 = vpop.f32.mrf.mxu1 }
 0x16f   : > { %2556 = vst.msk [vmem:[%s3940_s12 + $0x60] sm:$0xff] %vm2147_vm3, %v2119_v23  ;;  %v2122_v25 = vadd.f32 %v3935_v32, %v2090_v31  ;;  %v2089_v39 = vadd.f32 %v1954_v51, %v1819_v34  ;;  %v1822_v41 = vadd.f32 %v3006_v38, %v1462_v55 }
 0x170   : > { %v1694_v24 = vpop.f32.mrf.mxu0  ;;  %v3059_v60 = vpop.f32.mrf.mxu1 }
 0x171   : > { %2559 = vst.msk [vmem:[%s3940_s12 + $0x78] sm:$0xff] %vm2147_vm3, %v2122_v25  ;;  %v2121_v50 = vadd.f32 %v3935_v32, %v2089_v39  ;;  %v2092_v15 = vadd.f32 %v3056_v53, %v1822_v41  ;;  %v1821_v44 = vadd.f32 %v1694_v24, %v1457_v59 }
 0x172   : > { %v3009_v45 = vpop.f32.mrf.mxu0  ;;  %v1974_v1 = vpop.f32.mrf.mxu1 }
 0x173   : > { %2558 = vst.msk [vmem:[%s3940_s12 + $0x70] sm:$0xff] %vm2147_vm3, %v2121_v50  ;;  %v2124_v18 = vadd.f32 %v3935_v32, %v2092_v15  ;;  %v2091_v57 = vadd.f32 %v1964_v58, %v1821_v44  ;;  %v1824_v16 = vadd.f32 %v3009_v45, %v1472_v62 }
 0x174   : > { %v1704_v46 = vpop.f32.mrf.mxu0  ;;  %v3062_v3 = vpop.f32.mrf.mxu1 }
 0x175   : > { %2561 = vst.msk [vmem:[%s3940_s12 + $0xa8] sm:$0xff] %vm2147_vm3, %v2124_v18  ;;  %v2123_v48 = vadd.f32 %v3935_v32, %v2091_v57  ;;  %v2094_v7 = vadd.f32 %v3059_v60, %v1824_v16  ;;  %v1823_v11 = vadd.f32 %v1704_v46, %v1467_v2 }
 0x176   : > { %v3012_v17 = vpop.f32.mrf.mxu0  ;;  %v1984_v13 = vpop.f32.mrf.mxu1 }
 0x177   : > { %2560 = vst.msk [vmem:[%s3940_s12 + $0xa0] sm:$0xff] %vm2147_vm3, %v2123_v48  ;;  %v2126_v21 = vadd.f32 %v3935_v32, %v2094_v7  ;;  %v2093_v51 = vadd.f32 %v1974_v1, %v1823_v11  ;;  %v1826_v52 = vadd.f32 %v3012_v17, %v1482_v9 }
 0x178   : > { %v1714_v22 = vpop.f32.mrf.mxu0  ;;  %v3065_v19 = vpop.f32.mrf.mxu1 }
 0x179   : > { %2563 = vst.msk [vmem:[%s3940_s12 + $0xb8] sm:$0xff] %vm2147_vm3, %v2126_v21  ;;  %v2125_v27 = vadd.f32 %v3935_v32, %v2093_v51  ;;  %v2096_v30 = vadd.f32 %v3062_v3, %v1826_v52  ;;  %v1825_v37 = vadd.f32 %v1714_v22, %v1477_v14 }
 0x17a   : > { %v3015_v53 = vpop.f32.mrf.mxu0  ;;  %v1994_v33 = vpop.f32.mrf.mxu1 }
 0x17b   : > { %2562 = vst.msk [vmem:[%s3940_s12 + $0xb0] sm:$0xff] %vm2147_vm3, %v2125_v27  ;;  %v2128_v55 = vadd.f32 %v3935_v32, %v2096_v30  ;;  %v2095_v23 = vadd.f32 %v1984_v13, %v1825_v37  ;;  %v1828_v31 = vadd.f32 %v3015_v53, %v1492_v26  ;;  %v4422_v26 = vld [vmem:[#allocation5_spill] sm:$0xff] }
 0x17c   : > { %v1724_v34 = vpop.f32.mrf.mxu0  ;;  %v3068_v42 = vpop.f32.mrf.mxu1  ;;  %v1542_v27 = vadd.f32 %v4422_v26, %v4421_v4 }
 0x17d   : > { %2565 = vst.msk [vmem:[%s3940_s12 + $0xe8] sm:$0xff] %vm2147_vm3, %v2128_v55  ;;  %v2127_v38 = vadd.f32 %v3935_v32, %v2095_v23  ;;  %v2098_v58 = vadd.f32 %v3065_v19, %v1828_v31  ;;  %v1827_v59 = vadd.f32 %v1724_v34, %v1487_v36  ;;  %v4424_v36 = vld [vmem:[#allocation3_spill] sm:$0xff] }
 0x17e   : > { %v3018_v25 = vpop.f32.mrf.mxu0  ;;  %v2004_v0 = vpop.f32.mrf.mxu1  ;;  %v1537_v55 = vadd.f32 %v4424_v36, %v4423_v6 }
 0x17f   : > { %2564 = vst.msk [vmem:[%s3940_s12 + $0xe0] sm:$0xff] %vm2147_vm3, %v2127_v38  ;;  %v2130_v39 = vadd.f32 %v3935_v32, %v2098_v58  ;;  %v2097_v41 = vadd.f32 %v1994_v33, %v1827_v59  ;;  %v1830_v24 = vadd.f32 %v3018_v25, %v1502_v54  ;;  %v4425_v38 = vld [vmem:[#allocation4_spill] sm:$0xff]  ;;  %v4426_v58 = vld [vmem:[#allocation9_spill] sm:$0xff] }
 0x180   : > { %v1734_v60 = vpop.f32.mrf.mxu0  ;;  %v3071_v20 = vpop.f32.mrf.mxu1  ;;  %v1552_v59 = vadd.f32 %v4426_v58, %v4425_v38 }
 0x181   : > { %2567 = vst.msk [vmem:[%s3940_s12 + $0xf8] sm:$0xff] %vm2147_vm3, %v2130_v39  ;;  %v2129_v62 = vadd.f32 %v3935_v32, %v2097_v41  ;;  %v2100_v50 = vadd.f32 %v3068_v42, %v1830_v24  ;;  %v1829_v15 = vadd.f32 %v1734_v60, %v1497_v10  ;;  %v4427_v24 = vld [vmem:[#allocation11_spill] sm:$0xff]  ;;  %v4428_v60 = vld [vmem:[#allocation6_spill] sm:$0xff] }
 0x182   : > { %v3021_v44 = vpop.f32.mrf.mxu0  ;;  %v2014_v43 = vpop.f32.mrf.mxu1 }
 0x183   : > { %2566 = vst.msk [vmem:[%s3940_s12 + $0xf0] sm:$0xff] %vm2147_vm3, %v2129_v62  ;;  %v2132_v45 = vadd.f32 %v3935_v32, %v2100_v50  ;;  %v2099_v1 = vadd.f32 %v2004_v0, %v1829_v15  ;;  %v1832_v2 = vadd.f32 %v3021_v44, %v1512_v40 }
 0x184   : > { %v1744_v18 = vpop.f32.mrf.mxu0  ;;  %v3074_v63 = vpop.f32.mrf.mxu1 }
 0x185   : > { %2569 = vst.msk [vmem:[%s3940_s12 + $0x128] sm:$0xff] %vm2147_vm3, %v2132_v45  ;;  %v2131_v57 = vadd.f32 %v3935_v32, %v2099_v1  ;;  %v2102_v16 = vadd.f32 %v3071_v20, %v1832_v2  ;;  %v1831_v46 = vadd.f32 %v1744_v18, %v1507_v61  ;;  %v1547_v20 = vadd.f32 %v4428_v60, %v4427_v24  ;;  %v4430_v61 = vld [vmem:[#allocation12_spill] sm:$0xff] }
 0x186   : > { %v3024_v3 = vpop.f32.mrf.mxu0  ;;  %v2024_v28 = vpop.f32.mrf.mxu1 }
 0x187   : > { %2568 = vst.msk [vmem:[%s3940_s12 + $0x120] sm:$0xff] %vm2147_vm3, %v2131_v57  ;;  %v2134_v9 = vadd.f32 %v3935_v32, %v2102_v16  ;;  %v2101_v48 = vadd.f32 %v2014_v43, %v1831_v46  ;;  %v1834_v7 = vadd.f32 %v3024_v3, %v1522_v12  ;;  %v4429_v43 = vld [vmem:[#allocation7_spill] sm:$0xff]  ;;  %v4431_v57 = vld [vmem:[#allocation13_spill] sm:$0xff]  ;;  %v4432_v16 = vld [vmem:[#allocation10_spill] sm:$0xff] }
 0x188   : > { %v1754_v11 = vpop.f32.mrf.mxu0  ;;  %v3077_v35 = vpop.f32.mrf.mxu1  ;;  %v1562_v45 = vadd.f32 %v4430_v61, %v4429_v43  ;;  %v1557_v46 = vadd.f32 %v4432_v16, %v4431_v57 }
 0x189   : > { %2571 = vst.msk [vmem:[%s3940_s12 + $0x138] sm:$0xff] %vm2147_vm3, %v2134_v9  ;;  %v2133_v17 = vadd.f32 %v3935_v32, %v2101_v48  ;;  %v2104_v13 = vadd.f32 %v3074_v63, %v1834_v7  ;;  %v1833_v14 = vadd.f32 %v1754_v11, %v1517_v56  ;;  %v4433_v48 = vld [vmem:[#allocation17_spill] sm:$0xff]  ;;  %v4434_v7 = vld [vmem:[#allocation14_spill] sm:$0xff] }
 0x18a   : > { %v3027_v21 = vpop.f32.mrf.mxu0  ;;  %v2034_v29 = vpop.f32.mrf.mxu1  ;;  %v1572_v11 = vadd.f32 %v4434_v7, %v4433_v48 }
 0x18b   : > { %2570 = vst.msk [vmem:[%s3940_s12 + $0x130] sm:$0xff] %vm2147_vm3, %v2133_v17  ;;  %v2136_v51 = vadd.f32 %v3935_v32, %v2104_v13  ;;  %v2103_v52 = vadd.f32 %v2024_v28, %v1833_v14  ;;  %v1836_v22 = vadd.f32 %v3027_v21, %v1532_v47  ;;  %v4435_v21 = vld [vmem:[#allocation16_spill] sm:$0xff] }
 0x18c   : > { %v1764_v19 = vpop.f32.mrf.mxu0  ;;  %v3080_v8 = vpop.f32.mrf.mxu1 }
 0x18d   : > { %2573 = vst.msk [vmem:[%s3940_s12 + $0x168] sm:$0xff] %vm2147_vm3, %v2136_v51  ;;  %v2135_v30 = vadd.f32 %v3935_v32, %v2103_v52  ;;  %v2106_v37 = vadd.f32 %v3077_v35, %v1836_v22  ;;  %v1835_v53 = vadd.f32 %v1764_v19, %v1527_v49 }
 0x18e   : > { %v3030_v33 = vpop.f32.mrf.mxu0  ;;  %v2044_v5 = vpop.f32.mrf.mxu1 }
 0x18f   : > { %2572 = vst.msk [vmem:[%s3940_s12 + $0x160] sm:$0xff] %vm2147_vm3, %v2135_v30  ;;  %v2138_v23 = vadd.f32 %v3935_v32, %v2106_v37  ;;  %v2105_v31 = vadd.f32 %v2034_v29, %v1835_v53  ;;  %v1838_v34 = vadd.f32 %v3030_v33, %v1542_v27  ;;  %v4436_v29 = vld [vmem:[#allocation15_spill] sm:$0xff] }
 0x190   : > { %v1774_v42 = vpop.f32.mrf.mxu0  ;;  %v3083_v54 = vpop.f32.mrf.mxu1  ;;  %v1567_v49 = vadd.f32 %v4436_v29, %v4435_v21 }
 0x191   : > { %2575 = vst.msk [vmem:[%s3940_s12 + $0x178] sm:$0xff] %vm2147_vm3, %v2138_v23  ;;  %v2137_v25 = vadd.f32 %v3935_v32, %v2105_v31  ;;  %v2108_v0 = vadd.f32 %v3080_v8, %v1838_v34  ;;  %v1837_v10 = vadd.f32 %v1774_v42, %v1537_v55 }
 0x192   : > { %v3033_v39 = vpop.f32.mrf.mxu0  ;;  %v2054_v41 = vpop.f32.mrf.mxu1 }
 0x193   : > { %2574 = vst.msk [vmem:[%s3940_s12 + $0x170] sm:$0xff] %vm2147_vm3, %v2137_v25  ;;  %v2140_v40 = vadd.f32 %v3935_v32, %v2108_v0  ;;  %v2107_v62 = vadd.f32 %v2044_v5, %v1837_v10  ;;  %v1840_v50 = vadd.f32 %v3033_v39, %v1552_v59 }
 0x194   : > { %v1784_v15 = vpop.f32.mrf.mxu0  ;;  %v3086_v44 = vpop.f32.mrf.mxu1 }
 0x195   : > { %2577 = vst.msk [vmem:[%s3940_s12 + $0x1a8] sm:$0xff] %vm2147_vm3, %v2140_v40  ;;  %v2139_v1 = vadd.f32 %v3935_v32, %v2107_v62  ;;  %v2110_v2 = vadd.f32 %v3083_v54, %v1840_v50  ;;  %v1839_v18 = vadd.f32 %v1784_v15, %v1547_v20 }
 0x196   : > { %v3036_v63 = vpop.f32.mrf.mxu0  ;;  %v2064_v12 = vpop.f32.mrf.mxu1 }
 0x197   : > { %2576 = vst.msk [vmem:[%s3940_s12 + $0x1a0] sm:$0xff] %vm2147_vm3, %v2139_v1  ;;  %v2142_v3 = vadd.f32 %v3935_v32, %v2110_v2  ;;  %v2109_v28 = vadd.f32 %v2054_v41, %v1839_v18  ;;  %v1842_v56 = vadd.f32 %v3036_v63, %v1562_v45 }
 0x198   : > { %v1794_v9 = vpop.f32.mrf.mxu0  ;;  %v3089_v14 = vpop.f32.mrf.mxu1 }
 0x199   : > { %2579 = vst.msk [vmem:[%s3940_s12 + $0x1b8] sm:$0xff] %vm2147_vm3, %v2142_v3  ;;  %v2141_v35 = vadd.f32 %v3935_v32, %v2109_v28  ;;  %v2112_v47 = vadd.f32 %v3086_v44, %v1842_v56  ;;  %v1841_v17 = vadd.f32 %v1794_v9, %v1557_v46 }
 0x19a   : > { %v3039_v13 = vpop.f32.mrf.mxu0  ;;  %v2074_v27 = vpop.f32.mrf.mxu1 }
 0x19b   : > { %2578 = vst.msk [vmem:[%s3940_s12 + $0x1b0] sm:$0xff] %vm2147_vm3, %v2141_v35  ;;  %v2144_v51 = vadd.f32 %v3935_v32, %v2112_v47  ;;  %v2111_v52 = vadd.f32 %v2064_v12, %v1841_v17  ;;  %v1844_v22 = vadd.f32 %v3039_v13, %v1572_v11 }
 0x19c   : > { %v1804_v19 = vpop.f32.mrf.mxu0 }
 0x19d   : > { %2581 = vst.msk [vmem:[%s3940_s12 + $0x1e8] sm:$0xff] %vm2147_vm3, %v2144_v51  ;;  %v2143_v8 = vadd.f32 %v3935_v32, %v2111_v52  ;;  %v2114_v4 = vadd.f32 %v3089_v14, %v1844_v22  ;;  %v1843_v26 = vadd.f32 %v1804_v19, %v1567_v49 }
 0x19f   : > { %2580 = vst.msk [vmem:[%s3940_s12 + $0x1e0] sm:$0xff] %vm2147_vm3, %v2143_v8  ;;  %v2146_v30 = vadd.f32 %v3935_v32, %v2114_v4  ;;  %v2113_v37 = vadd.f32 %v2074_v27, %v1843_v26 }
 0x1a1   : > { %2583 = vst.msk [vmem:[%s3940_s12 + $0x1f8] sm:$0xff] %vm2147_vm3, %v2146_v30  ;;  %v2145_v53 = vadd.f32 %v3935_v32, %v2113_v37 }
 0x1a3   : > { %2582 = vst.msk [vmem:[%s3940_s12 + $0x1f0] sm:$0xff] %vm2147_vm3, %v2145_v53 }
 0x1a4 PF: > { %s14_s19 = sadd.s32 1, %s3171_s19   ;;  %s4437_s15 = smov %s3163_s17 }
 0x1a5   : > { %p11_p9 = scmp.ge.s32.totalorder %s14_s19, 10   ;;  %s4438_s16 = smov %s3167_s18 }
 0x1a6   : > { %s4439_s17 = smov %s4442_s20  ;;  %s4440_s18 = smov %s4446_s21 }
 0x1a7   :  { %13 = sbr.rel (!%p11_p9) target bundleno = 3 (0x3), region = 75 }

</bundles_post_ra>
